<compile_context>
chip_gen: v5e
topology: v5e:2x2
jax: 0.10.0
libtpu: 0.0.40
codegen_flags: <defaults>
</compile_context>

<pallas_src>
import functools

import jax
import jax.numpy as jnp
from jax.experimental import pallas as pl
from jax.experimental.pallas import tpu as pltpu


def _sigmoid(x):
    # exp and the approximate reciprocal both land on the EUP slot.
    return pl.reciprocal(1.0 + jnp.exp(-x), approx=True)


# ------------------------- fused kernel ------------------------------------

def _bottleneck_kernel(x_ref, mask_ref,
                       w1_ref, s1_ref, t1_ref,
                       w2_ref, s2_ref, t2_ref,
                       w3_ref, s3_ref, t3_ref,
                       wsc_ref, ssc_ref, tsc_ref,
                       caw1_ref, cab1_ref, caw2_ref, cab2_ref,
                       saw_ref, sab_ref,
                       o_ref, *, H, W, use_cbam):
    HW = H * W
    f32 = jnp.float32
    bf16 = jnp.bfloat16

    # 3x3 taps (dy, dx) and the lane-roll that brings pixel (y+dy, x+dx)
    # onto flat position y*W + x.
    taps = [(dy, dx) for dy in (-1, 0, 1) for dx in (-1, 0, 1)]
    shifts = [(-(dy * W + dx)) % HW for dy, dx in taps]

    x = x_ref[0]                                                     # (Cin, HW) bf16

    # ---- conv1 (1x1) + bn1 + relu ---------------------------------------
    h1 = jnp.dot(w1_ref[...], x, preferred_element_type=f32)         # (planes, HW)
    h1 = jnp.maximum(h1 * s1_ref[...] + t1_ref[...], 0.0)

    # ---- conv2 (3x3, stride 1, pad 1): im2col via lane rolls + 1 matmul --
    parts = []
    for k, s in enumerate(shifts):
        shifted = h1 if s == 0 else pltpu.roll(h1, s, axis=1)
        if taps[k] != (0, 0):
            shifted = shifted * mask_ref[k:k + 1, :]
        parts.append(shifted)
    im2col = jnp.concatenate(parts, axis=0).astype(bf16)             # (9*planes, HW)
    h2 = jnp.dot(w2_ref[...], im2col, preferred_element_type=f32)    # (planes, HW)
    h2 = jnp.maximum(h2 * s2_ref[...] + t2_ref[...], 0.0)

    # ---- conv3 (1x1) + bn3 (no relu) -------------------------------------
    h3 = jnp.dot(w3_ref[...], h2.astype(bf16), preferred_element_type=f32)
    h3 = h3 * s3_ref[...] + t3_ref[...]                              # (Cexp, HW)

    out = h3
    if use_cbam:
        # ---- channel attention: global avg/max pool -> shared MLP -> sigmoid
        avg = jnp.mean(h3, axis=1, keepdims=True)                    # (Cexp, 1)
        mx = jnp.max(h3, axis=1, keepdims=True)                      # (Cexp, 1)
        v = jnp.concatenate([avg, mx], axis=1)                       # (Cexp, 2)
        hm = jnp.dot(caw1_ref[...], v, preferred_element_type=f32) + cab1_ref[...]
        hm = jnp.maximum(hm, 0.0)                                    # (Cm, 2)
        o2 = jnp.dot(caw2_ref[...], hm, preferred_element_type=f32) + cab2_ref[...]
        catt = _sigmoid(o2[:, 0:1] + o2[:, 1:2])                     # (Cexp, 1)
        fp = h3 * catt                                               # (Cexp, HW)

        # ---- spatial attention: 3x3 conv over [max, avg] channel pools ----
        maxc = jnp.max(fp, axis=0, keepdims=True)                    # (1, HW)
        avgc = jnp.mean(fp, axis=0, keepdims=True)                   # (1, HW)
        pool = jnp.concatenate([maxc, avgc], axis=0)                 # (2, HW)
        acc = jnp.zeros((2, HW), f32)
        for k, s in enumerate(shifts):
            shifted = pool if s == 0 else pltpu.roll(pool, s, axis=1)
            if taps[k] != (0, 0):
                shifted = shifted * mask_ref[k:k + 1, :]
            acc = acc + shifted * saw_ref[:, k:k + 1]
        logit = jnp.sum(acc, axis=0, keepdims=True) + sab_ref[...]   # (1, HW)
        out = fp * _sigmoid(logit)

    # ---- shortcut (1x1 conv + bn) + residual + relu -----------------------
    sc = jnp.dot(wsc_ref[...], x, preferred_element_type=f32)        # (Cexp, HW)
    sc = sc * ssc_ref[...] + tsc_ref[...]
    o_ref[0] = jnp.maximum(out + sc, 0.0)


# ------------------------- wrapper ------------------------------------------

def _conv3x3_masks(H, W):
    """0/1 validity mask per 3x3 tap on the flattened HW axis ('same' padding)."""
    yy, xx = jnp.meshgrid(jnp.arange(H), jnp.arange(W), indexing="ij")
    yy = yy.reshape(1, -1)
    xx = xx.reshape(1, -1)
    rows = []
    for dy in (-1, 0, 1):
        for dx in (-1, 0, 1):
            valid = ((yy + dy >= 0) & (yy + dy < H) &
                     (xx + dx >= 0) & (xx + dx < W))
            rows.append(valid)
    return jnp.concatenate(rows, axis=0).astype(jnp.float32)         # (9, H*W)


def bottleneck_forward(x_nchw, p, *, use_cbam=True):
    N, Cin, H, W = x_nchw.shape
    HW = H * W
    planes = p["w1"].shape[0]
    Cexp = p["w3"].shape[0]
    Cm = p["ca_w1"].shape[0]
    bf16 = jnp.bfloat16

    x = x_nchw.reshape(N, Cin, HW).astype(bf16)      # per-batch (C, HW) view
    masks = _conv3x3_masks(H, W)
    w2m = p["w2"].reshape(planes, 9 * planes).astype(bf16)

    def full(*shape):
        return pl.BlockSpec(shape, lambda b, _s=len(shape): (0,) * _s)

    kernel = functools.partial(_bottleneck_kernel, H=H, W=W, use_cbam=use_cbam)
    out = pl.pallas_call(
        kernel,
        grid=(N,),
        in_specs=[
            pl.BlockSpec((1, Cin, HW), lambda b: (b, 0, 0)),         # x
            full(9, HW),                                             # conv masks
            full(planes, Cin), full(planes, 1), full(planes, 1),     # conv1/bn1
            full(planes, 9 * planes), full(planes, 1), full(planes, 1),  # conv2/bn2
            full(Cexp, planes), full(Cexp, 1), full(Cexp, 1),        # conv3/bn3
            full(Cexp, Cin), full(Cexp, 1), full(Cexp, 1),           # shortcut
            full(Cm, Cexp), full(Cm, 1),                             # CA mlp 1
            full(Cexp, Cm), full(Cexp, 1),                           # CA mlp 2
            full(2, 9), full(1, 1),                                  # SA conv
        ],
        out_specs=pl.BlockSpec((1, Cexp, HW), lambda b: (b, 0, 0)),
        out_shape=jax.ShapeDtypeStruct((N, Cexp, HW), jnp.float32),
        compiler_params=pltpu.CompilerParams(
            dimension_semantics=("parallel",)),
    )(x, masks,
      p["w1"].astype(bf16), p["s1"], p["t1"],
      w2m, p["s2"], p["t2"],
      p["w3"].astype(bf16), p["s3"], p["t3"],
      p["wsc"].astype(bf16), p["ssc"], p["tsc"],
      p["ca_w1"], p["ca_b1"], p["ca_w2"], p["ca_b2"],
      p["sa_w"], p["sa_b"])
    return out.reshape(N, Cexp, H, W)                # already NCHW


# ------------------------- reference (pure JAX) ------------------------------

def reference_forward(x_nchw, p, *, use_cbam=True):
    relu = lambda v: jnp.maximum(v, 0.0)
    c = lambda a: a[:, 0]                            # (C, 1) -> (C,)
    x = jnp.transpose(x_nchw, (0, 2, 3, 1))          # NHWC
    h1 = relu(jnp.einsum("nhwc,oc->nhwo", x, p["w1"]) * c(p["s1"]) + c(p["t1"]))
    Cout, _, Cin2 = p["w2"].shape
    w2_hwio = p["w2"].reshape(Cout, 3, 3, Cin2).transpose(1, 2, 3, 0)
    h2 = jax.lax.conv_general_dilated(h1, w2_hwio, (1, 1), "SAME",
                                      dimension_numbers=("NHWC", "HWIO", "NHWC"))
    h2 = relu(h2 * c(p["s2"]) + c(p["t2"]))
    h3 = jnp.einsum("nhwc,oc->nhwo", h2, p["w3"]) * c(p["s3"]) + c(p["t3"])
    out = h3
    if use_cbam:
        avg = jnp.mean(h3, axis=(1, 2))
        mx = jnp.max(h3, axis=(1, 2))
        bott = lambda v: (relu(v @ p["ca_w1"].T + c(p["ca_b1"])) @ p["ca_w2"].T
                          + c(p["ca_b2"]))
        catt = jax.nn.sigmoid(bott(avg) + bott(mx))
        fp = h3 * catt[:, None, None, :]
        maxc = jnp.max(fp, axis=-1, keepdims=True)
        avgc = jnp.mean(fp, axis=-1, keepdims=True)
        pool = jnp.concatenate([maxc, avgc], axis=-1)
        sa_hwio = p["sa_w"].reshape(2, 3, 3).transpose(1, 2, 0)[..., None]
        satt = jax.lax.conv_general_dilated(pool, sa_hwio, (1, 1), "SAME",
                                            dimension_numbers=("NHWC", "HWIO", "NHWC"))
        out = fp * jax.nn.sigmoid(satt + p["sa_b"][0, 0])
    sc = jnp.einsum("nhwc,oc->nhwo", x, p["wsc"]) * c(p["ssc"]) + c(p["tsc"])
    return jnp.transpose(relu(out + sc), (0, 3, 1, 2))


# ------------------------- parameter init ------------------------------------

def fold_bn(gamma, beta, mean, var, eps=1e-5):
    scale = gamma / jnp.sqrt(var + eps)
    shift = beta - mean * scale
    return scale.reshape(-1, 1), shift.reshape(-1, 1)     # per-channel columns


def init_params(key, in_planes, planes, reduction_ratio=1):
    Cexp = 4 * planes
    Cm = int(Cexp / float(reduction_ratio))
    ks = jax.random.split(key, 26)
    nrm = lambda k, s, sc=0.1: sc * jax.random.normal(k, s, jnp.float32)
    uni = lambda k, s: jax.random.uniform(k, s, jnp.float32, 0.5, 1.5)

    def bn(k1, k2, k3, k4, cdim):
        return fold_bn(uni(k1, (cdim,)), nrm(k2, (cdim,)),
                       nrm(k3, (cdim,)), uni(k4, (cdim,)))

    p = {}
    p["w1"] = nrm(ks[0], (planes, in_planes))            # (Cout, Cin)
    p["s1"], p["t1"] = bn(ks[1], ks[2], ks[3], ks[4], planes)
    p["w2"] = nrm(ks[5], (planes, 9, planes))            # (Cout, tap, Cin)
    p["s2"], p["t2"] = bn(ks[6], ks[7], ks[8], ks[9], planes)
    p["w3"] = nrm(ks[10], (Cexp, planes))
    p["s3"], p["t3"] = bn(ks[11], ks[12], ks[13], ks[14], Cexp)
    p["wsc"] = nrm(ks[15], (Cexp, in_planes))
    p["ssc"], p["tsc"] = bn(ks[16], ks[17], ks[18], ks[19], Cexp)
    # CBAM
    p["ca_w1"] = nrm(ks[20], (Cm, Cexp))
    p["ca_b1"] = nrm(ks[21], (Cm, 1))
    p["ca_w2"] = nrm(ks[22], (Cexp, Cm))
    p["ca_b2"] = nrm(ks[23], (Cexp, 1))
    p["sa_w"] = nrm(ks[24], (2, 9))                      # [max/avg channel, tap]
    p["sa_b"] = nrm(ks[25], (1, 1))
    return p


# ------------------------- main -----------------------------------------------

if __name__ == "__main__":
    key = jax.random.PRNGKey(0)
    kx, kp = jax.random.split(key)

    N, in_planes, planes, H, W = 2, 16, 8, 16, 16        # expansion*planes = 32
    x = jax.random.normal(kx, (N, in_planes, H, W), jnp.float32)   # NCHW
    params = init_params(kp, in_planes, planes, reduction_ratio=1)

    out = jax.block_until_ready(bottleneck_forward(x, params, use_cbam=True))
    ref = reference_forward(x, params, use_cbam=True)
    assert out.shape == (N, 4 * planes, H, W), out.shape
    assert bool(jnp.all(jnp.isfinite(out)))
    # bf16-in / f32-acc matmuls vs f32 reference -> 2e-2 tolerance.
    assert bool(jnp.allclose(out, ref, atol=2e-2, rtol=2e-2)), (
        float(jnp.max(jnp.abs(out - ref))))

    out2 = jax.block_until_ready(bottleneck_forward(x, params, use_cbam=False))
    ref2 = reference_forward(x, params, use_cbam=False)
    assert bool(jnp.allclose(out2, ref2, atol=2e-2, rtol=2e-2)), (
        float(jnp.max(jnp.abs(out2 - ref2))))

    print("KERNEL_OK")
</pallas_src>

<mosaic_0001>
module attributes {stable_mosaic.version = 11 : i64} {
  func.func @_bottleneck_kernel(%arg0: i32, %arg1: memref<1x16x256xbf16, #tpu.memory_space<vmem>>, %arg2: memref<9x256xf32, #tpu.memory_space<vmem>>, %arg3: memref<8x16xbf16, #tpu.memory_space<vmem>>, %arg4: memref<8x1xf32, #tpu.memory_space<vmem>>, %arg5: memref<8x1xf32, #tpu.memory_space<vmem>>, %arg6: memref<8x72xbf16, #tpu.memory_space<vmem>>, %arg7: memref<8x1xf32, #tpu.memory_space<vmem>>, %arg8: memref<8x1xf32, #tpu.memory_space<vmem>>, %arg9: memref<32x8xbf16, #tpu.memory_space<vmem>>, %arg10: memref<32x1xf32, #tpu.memory_space<vmem>>, %arg11: memref<32x1xf32, #tpu.memory_space<vmem>>, %arg12: memref<32x16xbf16, #tpu.memory_space<vmem>>, %arg13: memref<32x1xf32, #tpu.memory_space<vmem>>, %arg14: memref<32x1xf32, #tpu.memory_space<vmem>>, %arg15: memref<32x32xf32, #tpu.memory_space<vmem>>, %arg16: memref<32x1xf32, #tpu.memory_space<vmem>>, %arg17: memref<32x32xf32, #tpu.memory_space<vmem>>, %arg18: memref<32x1xf32, #tpu.memory_space<vmem>>, %arg19: memref<2x9xf32, #tpu.memory_space<vmem>>, %arg20: memref<1x1xf32, #tpu.memory_space<vmem>>, %arg21: memref<1x32x256xf32, #tpu.memory_space<vmem>>) attributes {dimension_semantics = [#tpu.dimension_semantics<parallel>], iteration_bounds = array<i64: 2>, scalar_prefetch = 0 : i64, scratch_operands = 0 : i64, tpu.core_type = #tpu.core_type<tc>, window_params = [{transform_indices = @transform_0, window_bounds = array<i64: 1, 16, 256>}, {pipeline_mode = #tpu.pipeline_mode<synchronous>, transform_indices = @transform_1, window_bounds = array<i64: 9, 256>}, {pipeline_mode = #tpu.pipeline_mode<synchronous>, transform_indices = @transform_2, window_bounds = array<i64: 8, 16>}, {pipeline_mode = #tpu.pipeline_mode<synchronous>, transform_indices = @transform_3, window_bounds = array<i64: 8, 1>}, {pipeline_mode = #tpu.pipeline_mode<synchronous>, transform_indices = @transform_4, window_bounds = array<i64: 8, 1>}, {pipeline_mode = #tpu.pipeline_mode<synchronous>, transform_indices = @transform_5, window_bounds = array<i64: 8, 72>}, {pipeline_mode = #tpu.pipeline_mode<synchronous>, transform_indices = @transform_6, window_bounds = array<i64: 8, 1>}, {pipeline_mode = #tpu.pipeline_mode<synchronous>, transform_indices = @transform_7, window_bounds = array<i64: 8, 1>}, {pipeline_mode = #tpu.pipeline_mode<synchronous>, transform_indices = @transform_8, window_bounds = array<i64: 32, 8>}, {pipeline_mode = #tpu.pipeline_mode<synchronous>, transform_indices = @transform_9, window_bounds = array<i64: 32, 1>}, {pipeline_mode = #tpu.pipeline_mode<synchronous>, transform_indices = @transform_10, window_bounds = array<i64: 32, 1>}, {pipeline_mode = #tpu.pipeline_mode<synchronous>, transform_indices = @transform_11, window_bounds = array<i64: 32, 16>}, {pipeline_mode = #tpu.pipeline_mode<synchronous>, transform_indices = @transform_12, window_bounds = array<i64: 32, 1>}, {pipeline_mode = #tpu.pipeline_mode<synchronous>, transform_indices = @transform_13, window_bounds = array<i64: 32, 1>}, {pipeline_mode = #tpu.pipeline_mode<synchronous>, transform_indices = @transform_14, window_bounds = array<i64: 32, 32>}, {pipeline_mode = #tpu.pipeline_mode<synchronous>, transform_indices = @transform_15, window_bounds = array<i64: 32, 1>}, {pipeline_mode = #tpu.pipeline_mode<synchronous>, transform_indices = @transform_16, window_bounds = array<i64: 32, 32>}, {pipeline_mode = #tpu.pipeline_mode<synchronous>, transform_indices = @transform_17, window_bounds = array<i64: 32, 1>}, {pipeline_mode = #tpu.pipeline_mode<synchronous>, transform_indices = @transform_18, window_bounds = array<i64: 2, 9>}, {pipeline_mode = #tpu.pipeline_mode<synchronous>, transform_indices = @transform_19, window_bounds = array<i64: 1, 1>}, {transform_indices = @transform_20, window_bounds = array<i64: 1, 32, 256>}]} {
    %c0 = arith.constant 0 : index
    %c0_0 = arith.constant 0 : index
    %c0_1 = arith.constant 0 : index
    %0 = vector.load %arg1[%c0, %c0_0, %c0_1] : memref<1x16x256xbf16, #tpu.memory_space<vmem>>, vector<1x16x256xbf16>
    %1 = vector.shape_cast %0 : vector<1x16x256xbf16> to vector<16x256xbf16>
    %c0_2 = arith.constant 0 : index
    %c0_3 = arith.constant 0 : index
    %2 = vector.load %arg3[%c0_2, %c0_3] : memref<8x16xbf16, #tpu.memory_space<vmem>>, vector<8x16xbf16>
    %cst = arith.constant dense<0.000000e+00> : vector<8x256xf32>
    %3 = tpu.matmul %2, %1, %cst {dimension_numbers = #tpu.dot_dimension_numbers<[1], [0], [0], [1], [0, 0, 1, 1], [], []>} : vector<8x16xbf16>, vector<16x256xbf16>, vector<8x256xf32> -> vector<8x256xf32>
    %c0_4 = arith.constant 0 : index
    %c0_5 = arith.constant 0 : index
    %4 = vector.load %arg4[%c0_4, %c0_5] : memref<8x1xf32, #tpu.memory_space<vmem>>, vector<8x1xf32>
    %5 = vector.broadcast %4 : vector<8x1xf32> to vector<8x256xf32>
    %6 = arith.mulf %3, %5 : vector<8x256xf32>
    %c0_6 = arith.constant 0 : index
    %c0_7 = arith.constant 0 : index
    %7 = vector.load %arg5[%c0_6, %c0_7] : memref<8x1xf32, #tpu.memory_space<vmem>>, vector<8x1xf32>
    %8 = vector.broadcast %7 : vector<8x1xf32> to vector<8x256xf32>
    %9 = arith.addf %6, %8 : vector<8x256xf32>
    %cst_8 = arith.constant 0.000000e+00 : f32
    %10 = vector.broadcast %cst_8 : f32 to vector<8x256xf32>
    %11 = arith.maximumf %9, %10 : vector<8x256xf32>
    %c17_i32 = arith.constant 17 : i32
    %12 = tpu.dynamic_rotate %11 by %c17_i32 dim 1 : vector<8x256xf32>, i32 -> vector<8x256xf32>
    %c0_9 = arith.constant 0 : index
    %c0_10 = arith.constant 0 : index
    %13 = vector.load %arg2[%c0_9, %c0_10] : memref<9x256xf32, #tpu.memory_space<vmem>>, vector<1x256xf32>
    %14 = vector.broadcast %13 : vector<1x256xf32> to vector<8x256xf32>
    %15 = arith.mulf %12, %14 : vector<8x256xf32>
    %c16_i32 = arith.constant 16 : i32
    %16 = tpu.dynamic_rotate %11 by %c16_i32 dim 1 : vector<8x256xf32>, i32 -> vector<8x256xf32>
    %c1 = arith.constant 1 : index
    %c0_11 = arith.constant 0 : index
    %17 = vector.load %arg2[%c1, %c0_11] : memref<9x256xf32, #tpu.memory_space<vmem>>, vector<1x256xf32>
    %18 = vector.broadcast %17 : vector<1x256xf32> to vector<8x256xf32>
    %19 = arith.mulf %16, %18 : vector<8x256xf32>
    %c15_i32 = arith.constant 15 : i32
    %20 = tpu.dynamic_rotate %11 by %c15_i32 dim 1 : vector<8x256xf32>, i32 -> vector<8x256xf32>
    %c2 = arith.constant 2 : index
    %c0_12 = arith.constant 0 : index
    %21 = vector.load %arg2[%c2, %c0_12] : memref<9x256xf32, #tpu.memory_space<vmem>>, vector<1x256xf32>
    %22 = vector.broadcast %21 : vector<1x256xf32> to vector<8x256xf32>
    %23 = arith.mulf %20, %22 : vector<8x256xf32>
    %c1_i32 = arith.constant 1 : i32
    %24 = tpu.dynamic_rotate %11 by %c1_i32 dim 1 : vector<8x256xf32>, i32 -> vector<8x256xf32>
    %c3 = arith.constant 3 : index
    %c0_13 = arith.constant 0 : index
    %25 = vector.load %arg2[%c3, %c0_13] : memref<9x256xf32, #tpu.memory_space<vmem>>, vector<1x256xf32>
    %26 = vector.broadcast %25 : vector<1x256xf32> to vector<8x256xf32>
    %27 = arith.mulf %24, %26 : vector<8x256xf32>
    %c255_i32 = arith.constant 255 : i32
    %28 = tpu.dynamic_rotate %11 by %c255_i32 dim 1 : vector<8x256xf32>, i32 -> vector<8x256xf32>
    %c5 = arith.constant 5 : index
    %c0_14 = arith.constant 0 : index
    %29 = vector.load %arg2[%c5, %c0_14] : memref<9x256xf32, #tpu.memory_space<vmem>>, vector<1x256xf32>
    %30 = vector.broadcast %29 : vector<1x256xf32> to vector<8x256xf32>
    %31 = arith.mulf %28, %30 : vector<8x256xf32>
    %c241_i32 = arith.constant 241 : i32
    %32 = tpu.dynamic_rotate %11 by %c241_i32 dim 1 : vector<8x256xf32>, i32 -> vector<8x256xf32>
    %c6 = arith.constant 6 : index
    %c0_15 = arith.constant 0 : index
    %33 = vector.load %arg2[%c6, %c0_15] : memref<9x256xf32, #tpu.memory_space<vmem>>, vector<1x256xf32>
    %34 = vector.broadcast %33 : vector<1x256xf32> to vector<8x256xf32>
    %35 = arith.mulf %32, %34 : vector<8x256xf32>
    %c240_i32 = arith.constant 240 : i32
    %36 = tpu.dynamic_rotate %11 by %c240_i32 dim 1 : vector<8x256xf32>, i32 -> vector<8x256xf32>
    %c7 = arith.constant 7 : index
    %c0_16 = arith.constant 0 : index
    %37 = vector.load %arg2[%c7, %c0_16] : memref<9x256xf32, #tpu.memory_space<vmem>>, vector<1x256xf32>
    %38 = vector.broadcast %37 : vector<1x256xf32> to vector<8x256xf32>
    %39 = arith.mulf %36, %38 : vector<8x256xf32>
    %c239_i32 = arith.constant 239 : i32
    %40 = tpu.dynamic_rotate %11 by %c239_i32 dim 1 : vector<8x256xf32>, i32 -> vector<8x256xf32>
    %c8 = arith.constant 8 : index
    %c0_17 = arith.constant 0 : index
    %41 = vector.load %arg2[%c8, %c0_17] : memref<9x256xf32, #tpu.memory_space<vmem>>, vector<1x256xf32>
    %42 = vector.broadcast %41 : vector<1x256xf32> to vector<8x256xf32>
    %43 = arith.mulf %40, %42 : vector<8x256xf32>
    %44 = tpu.concatenate %15, %19, %23, %27, %11, %31, %35, %39, %43 in 0 : vector<8x256xf32>, vector<8x256xf32>, vector<8x256xf32>, vector<8x256xf32>, vector<8x256xf32>, vector<8x256xf32>, vector<8x256xf32>, vector<8x256xf32>, vector<8x256xf32> -> vector<72x256xf32>
    %45 = arith.truncf %44 : vector<72x256xf32> to vector<72x256xbf16>
    %c0_18 = arith.constant 0 : index
    %c0_19 = arith.constant 0 : index
    %46 = vector.load %arg6[%c0_18, %c0_19] : memref<8x72xbf16, #tpu.memory_space<vmem>>, vector<8x72xbf16>
    %cst_20 = arith.constant dense<0.000000e+00> : vector<8x256xf32>
    %47 = tpu.matmul %46, %45, %cst_20 {dimension_numbers = #tpu.dot_dimension_numbers<[1], [0], [0], [1], [0, 0, 1, 1], [], []>} : vector<8x72xbf16>, vector<72x256xbf16>, vector<8x256xf32> -> vector<8x256xf32>
    %c0_21 = arith.constant 0 : index
    %c0_22 = arith.constant 0 : index
    %48 = vector.load %arg7[%c0_21, %c0_22] : memref<8x1xf32, #tpu.memory_space<vmem>>, vector<8x1xf32>
    %49 = vector.broadcast %48 : vector<8x1xf32> to vector<8x256xf32>
    %50 = arith.mulf %47, %49 : vector<8x256xf32>
    %c0_23 = arith.constant 0 : index
    %c0_24 = arith.constant 0 : index
    %51 = vector.load %arg8[%c0_23, %c0_24] : memref<8x1xf32, #tpu.memory_space<vmem>>, vector<8x1xf32>
    %52 = vector.broadcast %51 : vector<8x1xf32> to vector<8x256xf32>
    %53 = arith.addf %50, %52 : vector<8x256xf32>
    %cst_25 = arith.constant 0.000000e+00 : f32
    %54 = vector.broadcast %cst_25 : f32 to vector<8x256xf32>
    %55 = arith.maximumf %53, %54 : vector<8x256xf32>
    %c0_26 = arith.constant 0 : index
    %c0_27 = arith.constant 0 : index
    %56 = vector.load %arg9[%c0_26, %c0_27] : memref<32x8xbf16, #tpu.memory_space<vmem>>, vector<32x8xbf16>
    %57 = arith.truncf %55 : vector<8x256xf32> to vector<8x256xbf16>
    %cst_28 = arith.constant dense<0.000000e+00> : vector<32x256xf32>
    %58 = tpu.matmul %56, %57, %cst_28 {dimension_numbers = #tpu.dot_dimension_numbers<[1], [0], [0], [1], [0, 0, 1, 1], [], []>} : vector<32x8xbf16>, vector<8x256xbf16>, vector<32x256xf32> -> vector<32x256xf32>
    %c0_29 = arith.constant 0 : index
    %c0_30 = arith.constant 0 : index
    %59 = vector.load %arg10[%c0_29, %c0_30] : memref<32x1xf32, #tpu.memory_space<vmem>>, vector<32x1xf32>
    %60 = vector.broadcast %59 : vector<32x1xf32> to vector<32x256xf32>
    %61 = arith.mulf %58, %60 : vector<32x256xf32>
    %c0_31 = arith.constant 0 : index
    %c0_32 = arith.constant 0 : index
    %62 = vector.load %arg11[%c0_31, %c0_32] : memref<32x1xf32, #tpu.memory_space<vmem>>, vector<32x1xf32>
    %63 = vector.broadcast %62 : vector<32x1xf32> to vector<32x256xf32>
    %64 = arith.addf %61, %63 : vector<32x256xf32>
    %cst_33 = arith.constant dense<0.000000e+00> : vector<32xf32>
    %65 = vector.multi_reduction <add>, %64, %cst_33 [1] : vector<32x256xf32> to vector<32xf32>
    %66 = vector.shape_cast %65 : vector<32xf32> to vector<32x1xf32>
    %cst_34 = arith.constant 2.560000e+02 : f32
    %67 = vector.broadcast %cst_34 : f32 to vector<32x1xf32>
    %68 = arith.divf %66, %67 : vector<32x1xf32>
    %cst_35 = arith.constant dense<0xFF800000> : vector<32xf32>
    %69 = vector.multi_reduction <maximumf>, %64, %cst_35 [1] : vector<32x256xf32> to vector<32xf32>
    %70 = vector.shape_cast %69 : vector<32xf32> to vector<32x1xf32>
    %71 = tpu.concatenate %68, %70 in 1 : vector<32x1xf32>, vector<32x1xf32> -> vector<32x2xf32>
    %c0_36 = arith.constant 0 : index
    %c0_37 = arith.constant 0 : index
    %72 = vector.load %arg15[%c0_36, %c0_37] : memref<32x32xf32, #tpu.memory_space<vmem>>, vector<32x32xf32>
    %cst_38 = arith.constant dense<0.000000e+00> : vector<32x2xf32>
    %73 = tpu.matmul %72, %71, %cst_38 {dimension_numbers = #tpu.dot_dimension_numbers<[1], [0], [0], [1], [0, 0, 1, 1], [], []>} : vector<32x32xf32>, vector<32x2xf32>, vector<32x2xf32> -> vector<32x2xf32>
    %c0_39 = arith.constant 0 : index
    %c0_40 = arith.constant 0 : index
    %74 = vector.load %arg16[%c0_39, %c0_40] : memref<32x1xf32, #tpu.memory_space<vmem>>, vector<32x1xf32>
    %75 = vector.broadcast %74 : vector<32x1xf32> to vector<32x2xf32>
    %76 = arith.addf %73, %75 : vector<32x2xf32>
    %cst_41 = arith.constant 0.000000e+00 : f32
    %77 = vector.broadcast %cst_41 : f32 to vector<32x2xf32>
    %78 = arith.maximumf %76, %77 : vector<32x2xf32>
    %c0_42 = arith.constant 0 : index
    %c0_43 = arith.constant 0 : index
    %79 = vector.load %arg17[%c0_42, %c0_43] : memref<32x32xf32, #tpu.memory_space<vmem>>, vector<32x32xf32>
    %cst_44 = arith.constant dense<0.000000e+00> : vector<32x2xf32>
    %80 = tpu.matmul %79, %78, %cst_44 {dimension_numbers = #tpu.dot_dimension_numbers<[1], [0], [0], [1], [0, 0, 1, 1], [], []>} : vector<32x32xf32>, vector<32x2xf32>, vector<32x2xf32> -> vector<32x2xf32>
    %c0_45 = arith.constant 0 : index
    %c0_46 = arith.constant 0 : index
    %81 = vector.load %arg18[%c0_45, %c0_46] : memref<32x1xf32, #tpu.memory_space<vmem>>, vector<32x1xf32>
    %82 = vector.broadcast %81 : vector<32x1xf32> to vector<32x2xf32>
    %83 = arith.addf %80, %82 : vector<32x2xf32>
    %84 = vector.extract_strided_slice %83 {offsets = [0, 0], sizes = [32, 1], strides = [1, 1]} : vector<32x2xf32> to vector<32x1xf32>
    %85 = vector.extract_strided_slice %83 {offsets = [0, 1], sizes = [32, 1], strides = [1, 1]} : vector<32x2xf32> to vector<32x1xf32>
    %86 = arith.addf %84, %85 : vector<32x1xf32>
    %cst_47 = arith.constant 0.000000e+00 : f32
    %87 = vector.broadcast %cst_47 : f32 to vector<32x1xf32>
    %88 = arith.subf %87, %86 : vector<32x1xf32>
    %89 = math.exp %88 : vector<32x1xf32>
    %cst_48 = arith.constant 1.000000e+00 : f32
    %90 = vector.broadcast %cst_48 : f32 to vector<32x1xf32>
    %91 = arith.addf %90, %89 : vector<32x1xf32>
    %92 = tpu.reciprocal %91 {approx = true} : vector<32x1xf32> -> vector<32x1xf32>
    %93 = vector.broadcast %92 : vector<32x1xf32> to vector<32x256xf32>
    %94 = arith.mulf %64, %93 : vector<32x256xf32>
    %cst_49 = arith.constant dense<0xFF800000> : vector<256xf32>
    %95 = vector.multi_reduction <maximumf>, %94, %cst_49 [0] : vector<32x256xf32> to vector<256xf32>
    %96 = vector.shape_cast %95 : vector<256xf32> to vector<1x256xf32>
    %cst_50 = arith.constant dense<0.000000e+00> : vector<256xf32>
    %97 = vector.multi_reduction <add>, %94, %cst_50 [0] : vector<32x256xf32> to vector<256xf32>
    %98 = vector.shape_cast %97 : vector<256xf32> to vector<1x256xf32>
    %cst_51 = arith.constant 3.200000e+01 : f32
    %99 = vector.broadcast %cst_51 : f32 to vector<1x256xf32>
    %100 = arith.divf %98, %99 : vector<1x256xf32>
    %101 = tpu.concatenate %96, %100 in 0 : vector<1x256xf32>, vector<1x256xf32> -> vector<2x256xf32>
    %cst_52 = arith.constant 0.000000e+00 : f32
    %102 = vector.broadcast %cst_52 : f32 to vector<2x256xf32>
    %c17_i32_53 = arith.constant 17 : i32
    %103 = tpu.dynamic_rotate %101 by %c17_i32_53 dim 1 : vector<2x256xf32>, i32 -> vector<2x256xf32>
    %c0_54 = arith.constant 0 : index
    %c0_55 = arith.constant 0 : index
    %104 = vector.load %arg2[%c0_54, %c0_55] : memref<9x256xf32, #tpu.memory_space<vmem>>, vector<1x256xf32>
    %105 = vector.broadcast %104 : vector<1x256xf32> to vector<2x256xf32>
    %106 = arith.mulf %103, %105 : vector<2x256xf32>
    %c0_56 = arith.constant 0 : index
    %c0_57 = arith.constant 0 : index
    %107 = vector.load %arg19[%c0_56, %c0_57] : memref<2x9xf32, #tpu.memory_space<vmem>>, vector<2x1xf32>
    %108 = vector.broadcast %107 : vector<2x1xf32> to vector<2x256xf32>
    %109 = arith.mulf %106, %108 : vector<2x256xf32>
    %110 = arith.addf %102, %109 : vector<2x256xf32>
    %c16_i32_58 = arith.constant 16 : i32
    %111 = tpu.dynamic_rotate %101 by %c16_i32_58 dim 1 : vector<2x256xf32>, i32 -> vector<2x256xf32>
    %c1_59 = arith.constant 1 : index
    %c0_60 = arith.constant 0 : index
    %112 = vector.load %arg2[%c1_59, %c0_60] : memref<9x256xf32, #tpu.memory_space<vmem>>, vector<1x256xf32>
    %113 = vector.broadcast %112 : vector<1x256xf32> to vector<2x256xf32>
    %114 = arith.mulf %111, %113 : vector<2x256xf32>
    %c0_61 = arith.constant 0 : index
    %c1_62 = arith.constant 1 : index
    %115 = vector.load %arg19[%c0_61, %c1_62] : memref<2x9xf32, #tpu.memory_space<vmem>>, vector<2x1xf32>
    %116 = vector.broadcast %115 : vector<2x1xf32> to vector<2x256xf32>
    %117 = arith.mulf %114, %116 : vector<2x256xf32>
    %118 = arith.addf %110, %117 : vector<2x256xf32>
    %c15_i32_63 = arith.constant 15 : i32
    %119 = tpu.dynamic_rotate %101 by %c15_i32_63 dim 1 : vector<2x256xf32>, i32 -> vector<2x256xf32>
    %c2_64 = arith.constant 2 : index
    %c0_65 = arith.constant 0 : index
    %120 = vector.load %arg2[%c2_64, %c0_65] : memref<9x256xf32, #tpu.memory_space<vmem>>, vector<1x256xf32>
    %121 = vector.broadcast %120 : vector<1x256xf32> to vector<2x256xf32>
    %122 = arith.mulf %119, %121 : vector<2x256xf32>
    %c0_66 = arith.constant 0 : index
    %c2_67 = arith.constant 2 : index
    %123 = vector.load %arg19[%c0_66, %c2_67] : memref<2x9xf32, #tpu.memory_space<vmem>>, vector<2x1xf32>
    %124 = vector.broadcast %123 : vector<2x1xf32> to vector<2x256xf32>
    %125 = arith.mulf %122, %124 : vector<2x256xf32>
    %126 = arith.addf %118, %125 : vector<2x256xf32>
    %c1_i32_68 = arith.constant 1 : i32
    %127 = tpu.dynamic_rotate %101 by %c1_i32_68 dim 1 : vector<2x256xf32>, i32 -> vector<2x256xf32>
    %c3_69 = arith.constant 3 : index
    %c0_70 = arith.constant 0 : index
    %128 = vector.load %arg2[%c3_69, %c0_70] : memref<9x256xf32, #tpu.memory_space<vmem>>, vector<1x256xf32>
    %129 = vector.broadcast %128 : vector<1x256xf32> to vector<2x256xf32>
    %130 = arith.mulf %127, %129 : vector<2x256xf32>
    %c0_71 = arith.constant 0 : index
    %c3_72 = arith.constant 3 : index
    %131 = vector.load %arg19[%c0_71, %c3_72] : memref<2x9xf32, #tpu.memory_space<vmem>>, vector<2x1xf32>
    %132 = vector.broadcast %131 : vector<2x1xf32> to vector<2x256xf32>
    %133 = arith.mulf %130, %132 : vector<2x256xf32>
    %134 = arith.addf %126, %133 : vector<2x256xf32>
    %c0_73 = arith.constant 0 : index
    %c4 = arith.constant 4 : index
    %135 = vector.load %arg19[%c0_73, %c4] : memref<2x9xf32, #tpu.memory_space<vmem>>, vector<2x1xf32>
    %136 = vector.broadcast %135 : vector<2x1xf32> to vector<2x256xf32>
    %137 = arith.mulf %101, %136 : vector<2x256xf32>
    %138 = arith.addf %134, %137 : vector<2x256xf32>
    %c255_i32_74 = arith.constant 255 : i32
    %139 = tpu.dynamic_rotate %101 by %c255_i32_74 dim 1 : vector<2x256xf32>, i32 -> vector<2x256xf32>
    %c5_75 = arith.constant 5 : index
    %c0_76 = arith.constant 0 : index
    %140 = vector.load %arg2[%c5_75, %c0_76] : memref<9x256xf32, #tpu.memory_space<vmem>>, vector<1x256xf32>
    %141 = vector.broadcast %140 : vector<1x256xf32> to vector<2x256xf32>
    %142 = arith.mulf %139, %141 : vector<2x256xf32>
    %c0_77 = arith.constant 0 : index
    %c5_78 = arith.constant 5 : index
    %143 = vector.load %arg19[%c0_77, %c5_78] : memref<2x9xf32, #tpu.memory_space<vmem>>, vector<2x1xf32>
    %144 = vector.broadcast %143 : vector<2x1xf32> to vector<2x256xf32>
    %145 = arith.mulf %142, %144 : vector<2x256xf32>
    %146 = arith.addf %138, %145 : vector<2x256xf32>
    %c241_i32_79 = arith.constant 241 : i32
    %147 = tpu.dynamic_rotate %101 by %c241_i32_79 dim 1 : vector<2x256xf32>, i32 -> vector<2x256xf32>
    %c6_80 = arith.constant 6 : index
    %c0_81 = arith.constant 0 : index
    %148 = vector.load %arg2[%c6_80, %c0_81] : memref<9x256xf32, #tpu.memory_space<vmem>>, vector<1x256xf32>
    %149 = vector.broadcast %148 : vector<1x256xf32> to vector<2x256xf32>
    %150 = arith.mulf %147, %149 : vector<2x256xf32>
    %c0_82 = arith.constant 0 : index
    %c6_83 = arith.constant 6 : index
    %151 = vector.load %arg19[%c0_82, %c6_83] : memref<2x9xf32, #tpu.memory_space<vmem>>, vector<2x1xf32>
    %152 = vector.broadcast %151 : vector<2x1xf32> to vector<2x256xf32>
    %153 = arith.mulf %150, %152 : vector<2x256xf32>
    %154 = arith.addf %146, %153 : vector<2x256xf32>
    %c240_i32_84 = arith.constant 240 : i32
    %155 = tpu.dynamic_rotate %101 by %c240_i32_84 dim 1 : vector<2x256xf32>, i32 -> vector<2x256xf32>
    %c7_85 = arith.constant 7 : index
    %c0_86 = arith.constant 0 : index
    %156 = vector.load %arg2[%c7_85, %c0_86] : memref<9x256xf32, #tpu.memory_space<vmem>>, vector<1x256xf32>
    %157 = vector.broadcast %156 : vector<1x256xf32> to vector<2x256xf32>
    %158 = arith.mulf %155, %157 : vector<2x256xf32>
    %c0_87 = arith.constant 0 : index
    %c7_88 = arith.constant 7 : index
    %159 = vector.load %arg19[%c0_87, %c7_88] : memref<2x9xf32, #tpu.memory_space<vmem>>, vector<2x1xf32>
    %160 = vector.broadcast %159 : vector<2x1xf32> to vector<2x256xf32>
    %161 = arith.mulf %158, %160 : vector<2x256xf32>
    %162 = arith.addf %154, %161 : vector<2x256xf32>
    %c239_i32_89 = arith.constant 239 : i32
    %163 = tpu.dynamic_rotate %101 by %c239_i32_89 dim 1 : vector<2x256xf32>, i32 -> vector<2x256xf32>
    %c8_90 = arith.constant 8 : index
    %c0_91 = arith.constant 0 : index
    %164 = vector.load %arg2[%c8_90, %c0_91] : memref<9x256xf32, #tpu.memory_space<vmem>>, vector<1x256xf32>
    %165 = vector.broadcast %164 : vector<1x256xf32> to vector<2x256xf32>
    %166 = arith.mulf %163, %165 : vector<2x256xf32>
    %c0_92 = arith.constant 0 : index
    %c8_93 = arith.constant 8 : index
    %167 = vector.load %arg19[%c0_92, %c8_93] : memref<2x9xf32, #tpu.memory_space<vmem>>, vector<2x1xf32>
    %168 = vector.broadcast %167 : vector<2x1xf32> to vector<2x256xf32>
    %169 = arith.mulf %166, %168 : vector<2x256xf32>
    %170 = arith.addf %162, %169 : vector<2x256xf32>
    %cst_94 = arith.constant dense<0.000000e+00> : vector<256xf32>
    %171 = vector.multi_reduction <add>, %170, %cst_94 [0] : vector<2x256xf32> to vector<256xf32>
    %172 = vector.shape_cast %171 : vector<256xf32> to vector<1x256xf32>
    %c0_95 = arith.constant 0 : index
    %c0_96 = arith.constant 0 : index
    %173 = vector.load %arg20[%c0_95, %c0_96] : memref<1x1xf32, #tpu.memory_space<vmem>>, vector<1x1xf32>
    %174 = vector.broadcast %173 : vector<1x1xf32> to vector<1x256xf32>
    %175 = arith.addf %172, %174 : vector<1x256xf32>
    %cst_97 = arith.constant 0.000000e+00 : f32
    %176 = vector.broadcast %cst_97 : f32 to vector<1x256xf32>
    %177 = arith.subf %176, %175 : vector<1x256xf32>
    %178 = math.exp %177 : vector<1x256xf32>
    %cst_98 = arith.constant 1.000000e+00 : f32
    %179 = vector.broadcast %cst_98 : f32 to vector<1x256xf32>
    %180 = arith.addf %179, %178 : vector<1x256xf32>
    %181 = tpu.reciprocal %180 {approx = true} : vector<1x256xf32> -> vector<1x256xf32>
    %182 = vector.broadcast %181 : vector<1x256xf32> to vector<32x256xf32>
    %183 = arith.mulf %94, %182 : vector<32x256xf32>
    %c0_99 = arith.constant 0 : index
    %c0_100 = arith.constant 0 : index
    %184 = vector.load %arg12[%c0_99, %c0_100] : memref<32x16xbf16, #tpu.memory_space<vmem>>, vector<32x16xbf16>
    %cst_101 = arith.constant dense<0.000000e+00> : vector<32x256xf32>
    %185 = tpu.matmul %184, %1, %cst_101 {dimension_numbers = #tpu.dot_dimension_numbers<[1], [0], [0], [1], [0, 0, 1, 1], [], []>} : vector<32x16xbf16>, vector<16x256xbf16>, vector<32x256xf32> -> vector<32x256xf32>
    %c0_102 = arith.constant 0 : index
    %c0_103 = arith.constant 0 : index
    %186 = vector.load %arg13[%c0_102, %c0_103] : memref<32x1xf32, #tpu.memory_space<vmem>>, vector<32x1xf32>
    %187 = vector.broadcast %186 : vector<32x1xf32> to vector<32x256xf32>
    %188 = arith.mulf %185, %187 : vector<32x256xf32>
    %c0_104 = arith.constant 0 : index
    %c0_105 = arith.constant 0 : index
    %189 = vector.load %arg14[%c0_104, %c0_105] : memref<32x1xf32, #tpu.memory_space<vmem>>, vector<32x1xf32>
    %190 = vector.broadcast %189 : vector<32x1xf32> to vector<32x256xf32>
    %191 = arith.addf %188, %190 : vector<32x256xf32>
    %192 = arith.addf %183, %191 : vector<32x256xf32>
    %cst_106 = arith.constant 0.000000e+00 : f32
    %193 = vector.broadcast %cst_106 : f32 to vector<32x256xf32>
    %194 = arith.maximumf %192, %193 : vector<32x256xf32>
    %c0_107 = arith.constant 0 : index
    %c0_108 = arith.constant 0 : index
    %c0_109 = arith.constant 0 : index
    %195 = vector.load %arg21[%c0_107, %c0_108, %c0_109] : memref<1x32x256xf32, #tpu.memory_space<vmem>>, vector<1x32x256xf32>
    %196 = vector.shape_cast %195 : vector<1x32x256xf32> to vector<32x256xf32>
    %197 = vector.shape_cast %194 : vector<32x256xf32> to vector<1x32x256xf32>
    tpu.vector_store %arg21[%c0_107, %c0_108, %c0_109], %197 {strides = array<i32>} : memref<1x32x256xf32, #tpu.memory_space<vmem>>, vector<1x32x256xf32>,
    return
  }
  func.func @transform_0(%arg0: i32) -> (i32, i32, i32) {
    %c0_i32 = arith.constant 0 : i32
    %c0_i32_0 = arith.constant 0 : i32
    %c0_i32_1 = arith.constant 0 : i32
    return %arg0, %c0_i32, %c0_i32_0 : i32, i32, i32
  }
  func.func @transform_1(%arg0: i32) -> (i32, i32) {
    %c0_i32 = arith.constant 0 : i32
    %c0_i32_0 = arith.constant 0 : i32
    %c0_i32_1 = arith.constant 0 : i32
    return %c0_i32, %c0_i32_0 : i32, i32
  }
  func.func @transform_2(%arg0: i32) -> (i32, i32) {
    %c0_i32 = arith.constant 0 : i32
    %c0_i32_0 = arith.constant 0 : i32
    %c0_i32_1 = arith.constant 0 : i32
    return %c0_i32, %c0_i32_0 : i32, i32
  }
  func.func @transform_3(%arg0: i32) -> (i32, i32) {
    %c0_i32 = arith.constant 0 : i32
    %c0_i32_0 = arith.constant 0 : i32
    %c0_i32_1 = arith.constant 0 : i32
    return %c0_i32, %c0_i32_0 : i32, i32
  }
  func.func @transform_4(%arg0: i32) -> (i32, i32) {
    %c0_i32 = arith.constant 0 : i32
    %c0_i32_0 = arith.constant 0 : i32
    %c0_i32_1 = arith.constant 0 : i32
    return %c0_i32, %c0_i32_0 : i32, i32
  }
  func.func @transform_5(%arg0: i32) -> (i32, i32) {
    %c0_i32 = arith.constant 0 : i32
    %c0_i32_0 = arith.constant 0 : i32
    %c0_i32_1 = arith.constant 0 : i32
    return %c0_i32, %c0_i32_0 : i32, i32
  }
  func.func @transform_6(%arg0: i32) -> (i32, i32) {
    %c0_i32 = arith.constant 0 : i32
    %c0_i32_0 = arith.constant 0 : i32
    %c0_i32_1 = arith.constant 0 : i32
    return %c0_i32, %c0_i32_0 : i32, i32
  }
  func.func @transform_7(%arg0: i32) -> (i32, i32) {
    %c0_i32 = arith.constant 0 : i32
    %c0_i32_0 = arith.constant 0 : i32
    %c0_i32_1 = arith.constant 0 : i32
    return %c0_i32, %c0_i32_0 : i32, i32
  }
  func.func @transform_8(%arg0: i32) -> (i32, i32) {
    %c0_i32 = arith.constant 0 : i32
    %c0_i32_0 = arith.constant 0 : i32
    %c0_i32_1 = arith.constant 0 : i32
    return %c0_i32, %c0_i32_0 : i32, i32
  }
  func.func @transform_9(%arg0: i32) -> (i32, i32) {
    %c0_i32 = arith.constant 0 : i32
    %c0_i32_0 = arith.constant 0 : i32
    %c0_i32_1 = arith.constant 0 : i32
    return %c0_i32, %c0_i32_0 : i32, i32
  }
  func.func @transform_10(%arg0: i32) -> (i32, i32) {
    %c0_i32 = arith.constant 0 : i32
    %c0_i32_0 = arith.constant 0 : i32
    %c0_i32_1 = arith.constant 0 : i32
    return %c0_i32, %c0_i32_0 : i32, i32
  }
  func.func @transform_11(%arg0: i32) -> (i32, i32) {
    %c0_i32 = arith.constant 0 : i32
    %c0_i32_0 = arith.constant 0 : i32
    %c0_i32_1 = arith.constant 0 : i32
    return %c0_i32, %c0_i32_0 : i32, i32
  }
  func.func @transform_12(%arg0: i32) -> (i32, i32) {
    %c0_i32 = arith.constant 0 : i32
    %c0_i32_0 = arith.constant 0 : i32
    %c0_i32_1 = arith.constant 0 : i32
    return %c0_i32, %c0_i32_0 : i32, i32
  }
  func.func @transform_13(%arg0: i32) -> (i32, i32) {
    %c0_i32 = arith.constant 0 : i32
    %c0_i32_0 = arith.constant 0 : i32
    %c0_i32_1 = arith.constant 0 : i32
    return %c0_i32, %c0_i32_0 : i32, i32
  }
  func.func @transform_14(%arg0: i32) -> (i32, i32) {
    %c0_i32 = arith.constant 0 : i32
    %c0_i32_0 = arith.constant 0 : i32
    %c0_i32_1 = arith.constant 0 : i32
    return %c0_i32, %c0_i32_0 : i32, i32
  }
  func.func @transform_15(%arg0: i32) -> (i32, i32) {
    %c0_i32 = arith.constant 0 : i32
    %c0_i32_0 = arith.constant 0 : i32
    %c0_i32_1 = arith.constant 0 : i32
    return %c0_i32, %c0_i32_0 : i32, i32
  }
  func.func @transform_16(%arg0: i32) -> (i32, i32) {
    %c0_i32 = arith.constant 0 : i32
    %c0_i32_0 = arith.constant 0 : i32
    %c0_i32_1 = arith.constant 0 : i32
    return %c0_i32, %c0_i32_0 : i32, i32
  }
  func.func @transform_17(%arg0: i32) -> (i32, i32) {
    %c0_i32 = arith.constant 0 : i32
    %c0_i32_0 = arith.constant 0 : i32
    %c0_i32_1 = arith.constant 0 : i32
    return %c0_i32, %c0_i32_0 : i32, i32
  }
  func.func @transform_18(%arg0: i32) -> (i32, i32) {
    %c0_i32 = arith.constant 0 : i32
    %c0_i32_0 = arith.constant 0 : i32
    %c0_i32_1 = arith.constant 0 : i32
    return %c0_i32, %c0_i32_0 : i32, i32
  }
  func.func @transform_19(%arg0: i32) -> (i32, i32) {
    %c0_i32 = arith.constant 0 : i32
    %c0_i32_0 = arith.constant 0 : i32
    %c0_i32_1 = arith.constant 0 : i32
    return %c0_i32, %c0_i32_0 : i32, i32
  }
  func.func @transform_20(%arg0: i32) -> (i32, i32, i32) {
    %c0_i32 = arith.constant 0 : i32
    %c0_i32_0 = arith.constant 0 : i32
    %c0_i32_1 = arith.constant 0 : i32
    return %arg0, %c0_i32, %c0_i32_0 : i32, i32, i32
  }
}

</mosaic_0001>

<bundles_post_ra>
// kernel: tpu_custom_call.1
= control target key start
LH: loop header
LB: loop body
LE: loop exit
PB: predicated region body
PF: predicated region fallthrough
CT: control target
= control target key end

     0   :  { %s2709_s0 = inlined_call_operand.vmem [shape: bf16[2,16,256], index: 0, kind: input, shape index: {}]   ;;  %s2710_s1 = inlined_call_operand.vmem [shape: f32[9,256], index: 1, kind: input, shape index: {}]   ;;  %s2711_s2 = inlined_call_operand.vmem [shape: bf16[8,16], index: 2, kind: input, shape index: {}]   ;;  %s2712_s3 = inlined_call_operand.vmem [shape: f32[8,1], index: 3, kind: input, shape index: {}]   ;;  %s2713_s4 = inlined_call_operand.vmem [shape: f32[8,1], index: 4, kind: input, shape index: {}]   ;;  %s2714_s5 = inlined_call_operand.vmem [shape: bf16[8,72], index: 5, kind: input, shape index: {}]   ;;  %s2715_s6 = inlined_call_operand.vmem [shape: f32[8,1], index: 6, kind: input, shape index: {}]   ;;  %s2716_s7 = inlined_call_operand.vmem [shape: f32[8,1], index: 7, kind: input, shape index: {}]   ;;  %s2717_s8 = inlined_call_operand.vmem [shape: bf16[32,8], index: 8, kind: input, shape index: {}]   ;;  %s2718_s9 = inlined_call_operand.vmem [shape: f32[32,1], index: 9, kind: input, shape index: {}]   ;;  %s2719_s10 = inlined_call_operand.vmem [shape: f32[32,1], index: 10, kind: input, shape index: {}]   ;;  %s2720_s11 = inlined_call_operand.vmem [shape: bf16[32,16], index: 11, kind: input, shape index: {}]   ;;  %s2721_s12 = inlined_call_operand.vmem [shape: f32[32,1], index: 12, kind: input, shape index: {}]   ;;  %s2722_s13 = inlined_call_operand.vmem [shape: f32[32,1], index: 13, kind: input, shape index: {}]   ;;  %s2723_s14 = inlined_call_operand.vmem [shape: f32[32,32], index: 14, kind: input, shape index: {}]   ;;  %s2724_s15 = inlined_call_operand.vmem [shape: f32[32,1], index: 15, kind: input, shape index: {}]   ;;  %s2725_s16 = inlined_call_operand.vmem [shape: f32[32,32], index: 16, kind: input, shape index: {}]   ;;  %s2726_s17 = inlined_call_operand.vmem [shape: f32[32,1], index: 17, kind: input, shape index: {}]   ;;  %s2727_s18 = inlined_call_operand.vmem [shape: f32[2,9], index: 18, kind: input, shape index: {}]   ;;  %s2728_s19 = inlined_call_operand.<no memory space> [shape: f32[1,1], index: 19, kind: input, shape index: {}]   ;;  %s2729_s20 = inlined_call_operand.hbm [shape: f32[2,32,256], index: 20, kind: output, shape index: {}]  }
   0x1   :  { %2752 = sst [smem:[#allocation10_spill]] %s2709_s0  ;;  %v25_v0 = vstv %s2728_s19 }
   0x2   :  { %2753 = sst [smem:[#allocation11_spill]] %s2710_s1  ;;  %26 = vst [vmem:[#allocation2] sm:$0x1] %v25_v0 }
   0x3   :  { %2754 = sst [smem:[#allocation12_spill]] %s2711_s2 }
   0x4   :  { %2755 = sst [smem:[#allocation13_spill]] %s2712_s3 }
   0x5   :  { %2756 = sst [smem:[#allocation14_spill]] %s2713_s4 }
   0x6   :  { %2757 = sst [smem:[#allocation15_spill]] %s2714_s5 }
   0x7   :  { %27 = vsyncpa [#allocation4], 0 }
   0x8   :  { %29 = vsyncpa [#allocation4 + $0x1], 0  ;;  %s2085_s23 = smov 0   ;;  %s2087_s24 = smov 0  }
   0x9   :  { %s2089_s2 = smov 0   ;;  %s2091_s25 = smov 0  }
   0xa LB: > { %2758 = sst [smem:[#allocation6_spill]] %s1951_s2  ;;  %s2106_s19 = sadd.s32 4294967295, %s1955_s25   ;;  %s1955_s25 = sphi %s2091_s25, %s2779_s25   ;;  %s1951_s2 = sphi %s2089_s2, %s2781_s2   ;;  %s1947_s24 = sphi %s2087_s24, %s2783_s24   ;;  %s1943_s23 = sphi %s2085_s23, %s2782_s23  }
   0xb   : > { %s1721_s3 = sadd.s32 4294967294, %s1955_s25   ;;  %s2110_s26 = sadd.s32 1, %s1955_s25  }
   0xc   : > { %2759 = sst [smem:[#allocation7_spill]] %s2110_s26  ;;  %s467_s27 = sadd.s32 1, %s1951_s2 }
   0xd   : > { %s464_s28 = ssub.s32 %s1955_s25, %s2110_s26  ;;  %p477_p0 = scmp.ne.s32.totalorder %s1951_s2, %s1947_s24 }
   0xe   : > { %p465_p1 = scmp.eq.s32.totalorder %s464_s28, 0  ;;  %p478_p2 = scmp.eq.s32.totalorder %s2106_s19, 1 }
   0xf   : > { %p483_p3 = scmp.ne.s32.totalorder %s1947_s24, %s1943_s23  ;;  %p484_p4 = scmp.eq.s32.totalorder %s1721_s3, 1 }
  0x10   : > { %s2121_s4 = scalar_select %p465_p1, %s1951_s2, %s467_s27  }
  0x11   : > { %p2123_p5 = por %p478_p2, %p477_p0  ;;  %p2127_p6 = por %p484_p4, %p483_p3 }
  0x12   : > { %2760 = sst [smem:[#allocation8_spill]] %s2121_s4  ;;  %p1724_p7 = scmp.ge.s32.totalorder %s1955_s25, 1 }
  0x13   : > { %s2762_s30 = scalar_select %p2127_p6, 1, 0 }
  0x14   : > { %p567_p8 = scmp.lt.s32.totalorder %s1955_s25, 3 }
  0x15   : > { %2763 = sst [smem:[#allocation9_spill]] %s2762_s30 }
  0x16   : > { %p568_p9 = pnand %p1724_p7, %p567_p8 }
  0x17   : > { %s2764_s1 = sld [smem:[#allocation13_spill]] (!%p568_p9)  ;;  %p625_p10 = scmp.lt.s32.totalorder (!%p568_p9), %s2106_s19, 1 }
  0x18   : > { %571 = sbr.rel (%p568_p9) target bundleno = 1579 (0x62b), region = 100  ;;  %s2765_s4 = sld [smem:[#allocation10_spill]] (!%p568_p9) }
  0x19   : > { %s2767_s30 = sld [smem:[#allocation12_spill]] (!%p568_p9)  ;;  %s2739_s26 = smov (!%p568_p9), 113  }
  0x1a   : > { %s2747_s27 = smov (!%p568_p9), 1   ;;  %s2745_s28 = smov (!%p568_p9), 17  }
  0x1b   : > { %s2769_s5 = sld [smem:[#allocation15_spill]] (!%p568_p9)  ;;  %s2775_s0 = smov (!%p568_p9), 113  }
  0x1c   : > { %s2776_s21 = smov (!%p568_p9), 112  }
  0x1d   : > { %v674_v1 = vld [vmem:[%s2764_s1] sm:$0xff]  ;;  %v1957_v2 = vmov 0   ;;  %s626_s22 = scalar_select %p625_p10, %s2106_s19, 1  ;;  %vm644_vm0 = vcmask 130048   ;;  %v956_v24 = vld [vmem:[%s2718_s9 + $0x10] sm:$0xff]  ;;  %v696_v31 = vlaneseq  ;;  %vm836_vm5 = vcmask 1043456  }
  0x1e   : > { %1851 = vset.pattern.permute.xlu0 %v1957_v2  ;;  %1852 = vset.pattern.permute.xlu1 %v1957_v2  ;;  %s2766_s1 = sld [smem:[#allocation14_spill]]  ;;  %v869_v23 = vld [vmem:[%s2715_s6] sm:$0xff]  ;;  %v988_v25 = vld [vmem:[%s2719_s10 + $0x10] sm:$0xff]  ;;  %vm832_vm10 = vcmask 588800   ;;  %vm903_vm11 = vcmask 64512   ;;  %vm1053_vm13 = vcmask 7168  }
  0x1f   : > { %677 = vperm.xlu0 %1851, %v674_v1   ;;  %1853 = vset.pattern.permute.xlu2 %v1957_v2  ;;  %s1784_s3 = sshll.u32 %s626_s22, 4  ;;  %v633_v10 = vld [vmem:[%s2767_s30] sm:$0xf]  ;;  %s2737_s30 = smov 112   ;;  %v2213_v35 = vand.u32 127, %v696_v31  ;;  %vm1086_vm14 = vcmask 261120  }
  0x20   : > { %s629_s2 = scalar_lea.vmem %s2765_s4, %s1784_s3  ;;  %s2735_s4 = smov 111   ;;  %v986_v26 = vld [vmem:[%s2719_s10] sm:$0xff] }
  0x21   : > { %v1730_v3 = vld [vmem:[%s629_s2] sm:$0xf]  ;;  %v1786_v4 = vld [vmem:[%s629_s2 + $0x4] sm:$0xf0]  ;;  %v1785_v5 = vld [vmem:[%s629_s2 + $0x4] sm:$0xf] }
  0x22   : > { %v2144_v6 = vor.u32 %v1786_v4, %v1730_v3  ;;  %v1732_v7 = vld [vmem:[%s629_s2 + $0x8] sm:$0xf0]  ;;  %s2749_s2 = smov 127   ;;  %s2741_s3 = smov 15   ;;  %vm809_vm1 = vcmp.lt.s32.totalorder %v2213_v35, 111  ;;  %vm793_vm2 = vcmp.lt.s32.totalorder %v2213_v35, 112 }
  0x23   : > { %v2149_v9 = vor.u32 %v1785_v5, %v1732_v7  ;;  %vm777_vm3 = vcmp.lt.s32.totalorder %v2213_v35, 113  ;;  %v877_v46 = vld [vmem:[%s2716_s7] sm:$0xff]  ;;  %vm761_vm4 = vcmp.lt.s32.totalorder %v2213_v35, 127  ;;  %v989_v7 = vld [vmem:[%s2719_s10 + $0x18] sm:$0xff]  ;;  %vm745_vm6 = vcmp.lt.s32.totalorder %v2213_v35, 1  ;;  %s2774_s22 = smov 15  }
  0x24   : > { %v682_v8 = vld [vmem:[%s2766_s1] sm:$0xff]  ;;  %655 = vmatpush.bf16.msra.mxu2 %v2144_v6  ;;  %vm729_vm7 = vcmp.lt.s32.totalorder %v2213_v35, 15  ;;  %vm698_vm8 = vcmp.lt.s32.totalorder %v2213_v35, 17  ;;  %vm713_vm9 = vcmp.lt.s32.totalorder %v2213_v35, 16  ;;  %s2770_s1 = smov 127  }
  0x25   : > { %668 = vmatpush.bf16.msra.mxu1 %v2149_v9 }
  0x27   : > { %685 = vperm.xlu0 %1851, %v682_v8   ;;  %1736 = vmatmul.msk.bf16.vlgmr.msra.gmra.mxu2 %vm644_vm0, %v633_v10 }
  0x28   : > { %1737 = vmatmul.msk.bf16.vlgmr.msra.gmra.mxu1 %vm644_vm0, %v633_v10 }
  0x91   : > { %v678_v11 = vpop.permute.xlu0 %677 }
  0x99   : > { %v686_v14 = vpop.permute.xlu0 %685 }
  0xa5   : > { %v670_v12 = vpop.f32.mrf.mxu1 }
  0xa6   : > { %v681_v13 = vmul.f32 %v678_v11, %v670_v12 }
  0xa8   : > { %v689_v15 = vadd.f32 %v686_v14, %v681_v13 }
  0xaa   : > { %v2158_v16 = vmax.f32 %v689_v15, 0.0  ;;  %v657_v17 = vpop.f32.mrf.mxu2 }
  0xab   : > { %v680_v18 = vmul.f32 %v678_v11, %v657_v17 }
  0xac   : > { %759 = vrot.lane.b32.xlu0 %v2158_v16, %s2749_s2  ;;  %775 = vrot.lane.b32.xlu2 %v2158_v16, %s2739_s26 }
  0xad   : > { %807 = vrot.lane.b32.xlu1 %v2158_v16, %s2735_s4  ;;  %v672_v19 = vpop.f32.mrf.mxu1  ;;  %v688_v20 = vadd.f32 %v686_v14, %v680_v18 }
  0xaf   : > { %v2166_v21 = vmax.f32 %v688_v20, 0.0 }
  0xb2   : > { %v659_v22 = vpop.f32.mrf.mxu2 }
  0xb4   : > { %789 = vrot.lane.b32.xlu0 %v2166_v21, %s2737_s30  ;;  %727 = vrot.lane.b32.xlu2 %v2158_v16, %s2741_s3 }
  0xb5   : > { %791 = vrot.lane.b32.xlu1 %v2158_v16, %s2737_s30 }
  0xbc   : > { %741 = vrot.lane.b32.xlu0 %v2166_v21, %s2747_s27  ;;  %773 = vrot.lane.b32.xlu2 %v2166_v21, %s2739_s26 }
  0xbd   : > { %805 = vrot.lane.b32.xlu1 %v2166_v21, %s2735_s4  ;;  %s2743_s4 = smov 16  }
  0xc4   : > { %694 = vrot.lane.b32.xlu0 %v2158_v16, %s2745_s28  ;;  %757 = vrot.lane.b32.xlu2 %v2166_v21, %s2749_s2  ;;  %s2777_s2 = smov 111  }
  0xc5   : > { %743 = vrot.lane.b32.xlu1 %v2158_v16, %s2747_s27  ;;  %s2772_s27 = smov 17  }
  0xcc   : > { %872 = vperm.xlu0 %1851, %v869_v23   ;;  %692 = vrot.lane.b32.xlu2 %v2166_v21, %s2745_s28  ;;  %s2773_s28 = smov 16  }
  0xcd   : > { %725 = vrot.lane.b32.xlu1 %v2166_v21, %s2741_s3  ;;  %s2768_s3 = sld [smem:[#allocation11_spill]] }
  0xd3   : > { %v2211_v34 = vld [vmem:[%s2768_s3 + $0x10] ss:$8 sm:$0x3]  ;;  %v2218_v36 = vld [vmem:[%s2768_s3 + $0x7] ss:$8 sm:$0x3] }
  0xd4   : > { %970 = vperm.xlu0 %1851, %v956_v24   ;;  %711 = vrot.lane.b32.xlu2 %v2158_v16, %s2743_s4  ;;  %v815_v37 = vperm.slane %v2211_v34, 0  ;;  %v816_v38 = vperm.slane %v2211_v34, 1  ;;  %v2228_v40 = vld [vmem:[%s2768_s3 + $0x6] ss:$8 sm:$0x3]  ;;  %v799_v42 = vperm.slane %v2218_v36, 0 }
  0xd5   : > { %709 = vrot.lane.b32.xlu1 %v2166_v21, %s2743_s4  ;;  %v800_v43 = vperm.slane %v2218_v36, 1  ;;  %v2242_v47 = vld [vmem:[%s2768_s3 + $0x5] ss:$8 sm:$0x3]  ;;  %v783_v52 = vperm.slane %v2228_v40, 0  ;;  %v784_v53 = vperm.slane %v2228_v40, 1 }
  0xd6   : > { %v767_v59 = vperm.slane %v2242_v47, 0  ;;  %v768_v60 = vperm.slane %v2242_v47, 1  ;;  %v2285_v15 = vld [vmem:[%s2768_s3 + $0x3] ss:$8 sm:$0x3]  ;;  %s2771_s4 = smov 1  }
  0xd7   : > { %v2290_v17 = vld [vmem:[%s2768_s3 + $0x2] ss:$8 sm:$0x3]  ;;  %v751_v18 = vperm.slane %v2285_v15, 0  ;;  %v752_v23 = vperm.slane %v2285_v15, 1 }
  0xd8   : > { %v735_v24 = vperm.slane %v2290_v17, 0  ;;  %v2316_v31 = vld [vmem:[%s2768_s3] ss:$8 sm:$0x3] }
  0xdc   : > { %1002 = vperm.xlu0 %1851, %v988_v25   ;;  %v736_v25 = vperm.slane %v2290_v17, 1 }
  0xdd   : > { %880 = vperm.xlu1 %1852, %v877_v46  }
  0xe4   : > { %992 = vperm.xlu0 %1851, %v986_v26  }
  0xe5   : > { %1007 = vperm.xlu1 %1852, %v989_v7   ;;  %v957_v7 = vld [vmem:[%s2718_s9 + $0x18] sm:$0xff] }
  0xe6   : > { %975 = vperm.xlu2 %1853, %v957_v7  }
 0x106   : > { %v776_v27 = vpop.permute.xlu2 %775 }
 0x10e   : > { %v2206_v28 = vpop.permute.xlu2 %727 }
 0x116   : > { %v774_v33 = vpop.permute.xlu2 %773 }
 0x117   : > { %v778_v55 = vsel %vm777_vm3, %v774_v33, %v776_v27  ;;  %v779_v56 = vsel %vm777_vm3, %v776_v27, %v774_v33 }
 0x118   : > { %v787_v4 = vmul.f32 %v783_v52, %v778_v55  ;;  %v788_v5 = vmul.f32 %v784_v53, %v779_v56 }
 0x11e   : > { %v760_v30 = vpop.permute.xlu0 %759  ;;  %v758_v54 = vpop.permute.xlu2 %757 }
 0x11f   : > { %v808_v29 = vpop.permute.xlu1 %807  ;;  %v762_v63 = vsel %vm761_vm4, %v758_v54, %v760_v30  ;;  %v763_v0 = vsel %vm761_vm4, %v760_v30, %v758_v54 }
 0x120   : > { %v771_v10 = vmul.f32 %v767_v59, %v762_v63  ;;  %v772_v11 = vmul.f32 %v768_v60, %v763_v0 }
 0x122   : > { %v825_v19 = vpack.c.bf16 %v771_v10, %v2166_v21  ;;  %v826_v20 = vpack.c.bf16 %v772_v11, %v2158_v16  ;;  %v954_v16 = vld [vmem:[%s2718_s9] sm:$0xff] }
 0x123   : > { %960 = vperm.xlu1 %1852, %v954_v16  }
 0x126   : > { %v790_v39 = vpop.permute.xlu0 %789  ;;  %v693_v22 = vpop.permute.xlu2 %692 }
 0x127   : > { %v792_v32 = vpop.permute.xlu1 %791 }
 0x128   : > { %v794_v48 = vsel %vm793_vm2, %v790_v39, %v792_v32  ;;  %v795_v49 = vsel %vm793_vm2, %v792_v32, %v790_v39 }
 0x129   : > { %v803_v61 = vmul.f32 %v799_v42, %v794_v48  ;;  %v804_v62 = vmul.f32 %v800_v43, %v795_v49  ;;  %v703_v48 = vperm.slane %v2316_v31, 0  ;;  %v704_v49 = vperm.slane %v2316_v31, 1 }
 0x12b   : > { %v827_v12 = vpack.c.bf16 %v803_v61, %v787_v4  ;;  %v828_v13 = vpack.c.bf16 %v804_v62, %v788_v5  ;;  %v831_v5 = vld [vmem:[%s2769_s5] sm:$0xf] }
 0x12e   : > { %v742_v14 = vpop.permute.xlu0 %741  ;;  %v712_v56 = vpop.permute.xlu2 %711 }
 0x12f   : > { %v806_v41 = vpop.permute.xlu1 %805 }
 0x130   : > { %v810_v44 = vsel %vm809_vm1, %v806_v41, %v808_v29  ;;  %v811_v45 = vsel %vm809_vm1, %v808_v29, %v806_v41 }
 0x131   : > { %v819_v50 = vmul.f32 %v815_v37, %v810_v44  ;;  %v820_v51 = vmul.f32 %v816_v38, %v811_v45 }
 0x133   : > { %v829_v57 = vpack.c.bf16 %v819_v50, %v819_v50  ;;  %v830_v58 = vpack.c.bf16 %v820_v51, %v820_v51 }
 0x135   : > { %v838_v1 = vsel %vm836_vm5, %v829_v57, 0  ;;  %v841_v3 = vsel %vm836_vm5, %v830_v58, 0 }
 0x136   : > { %846 = vmatpush.bf16.msrb.mxu2 %v838_v1  ;;  %859 = vmatpush.bf16.msra.mxu3 %v841_v3  ;;  %v695_v44 = vpop.permute.xlu0 %694 }
 0x137   : > { %v744_v8 = vpop.permute.xlu1 %743  ;;  %v699_v54 = vsel %vm698_vm8, %v693_v22, %v695_v44  ;;  %v700_v55 = vsel %vm698_vm8, %v695_v44, %v693_v22  ;;  %v955_v22 = vld [vmem:[%s2718_s9 + $0x8] sm:$0xff] }
 0x138   : > { %v746_v26 = vsel %vm745_vm6, %v742_v14, %v744_v8  ;;  %v747_v27 = vsel %vm745_vm6, %v744_v8, %v742_v14  ;;  %v707_v62 = vmul.f32 %v703_v48, %v700_v55  ;;  %v708_v63 = vmul.f32 %v704_v49, %v699_v54  ;;  %965 = vperm.xlu2 %1853, %v955_v22   ;;  %v1788_v44 = vld [vmem:[%s2717_s8 + $0x8] sm:$0xff] }
 0x139   : > { %v755_v32 = vmul.f32 %v751_v18, %v747_v27  ;;  %v756_v33 = vmul.f32 %v752_v23, %v746_v26 }
 0x13a   : > { %847 = vmatpush.bf16.msrb.mxu2 %v827_v12  ;;  %860 = vmatpush.bf16.msra.mxu3 %v828_v13 }
 0x13e   : > { %848 = vmatpush.bf16.msrb.mxu2 %v825_v19  ;;  %861 = vmatpush.bf16.msra.mxu3 %v826_v20  ;;  %v873_v8 = vpop.permute.xlu0 %872 }
 0x13f   : > { %v726_v21 = vpop.permute.xlu1 %725 }
 0x140   : > { %v730_v29 = vsel %vm729_vm7, %v726_v21, %v2206_v28  ;;  %v731_v30 = vsel %vm729_vm7, %v2206_v28, %v726_v21  ;;  %v2329_v28 = vld [vmem:[%s2768_s3 + $0x1] ss:$8 sm:$0x3] }
 0x141   : > { %v739_v39 = vmul.f32 %v735_v24, %v731_v30  ;;  %v740_v41 = vmul.f32 %v736_v25, %v730_v29  ;;  %v719_v50 = vperm.slane %v2329_v28, 0  ;;  %v720_v51 = vperm.slane %v2329_v28, 1 }
 0x143   : > { %v823_v45 = vpack.c.bf16 %v755_v32, %v739_v39  ;;  %v824_v46 = vpack.c.bf16 %v756_v33, %v740_v41  ;;  %v1787_v39 = vld [vmem:[%s2717_s8] sm:$0xff]  ;;  %v987_v41 = vld [vmem:[%s2719_s10 + $0x8] sm:$0xff] }
 0x144   : > { %997 = vperm.xlu2 %1853, %v987_v41  }
 0x145   : > { %849 = vmatpush.bf16.msrb.mxu2 %v823_v45  ;;  %862 = vmatpush.bf16.msra.mxu3 %v824_v46  ;;  %v976_v45 = vpop.permute.xlu2 %975 }
 0x147   : > { %v710_v57 = vpop.permute.xlu1 %709 }
 0x148   : > { %v714_v58 = vsel %vm713_vm9, %v710_v57, %v712_v56  ;;  %v715_v61 = vsel %vm713_vm9, %v712_v56, %v710_v57  ;;  %v971_v56 = vpop.permute.xlu0 %970 }
 0x149   : > { %v723_v0 = vmul.f32 %v719_v50, %v715_v61  ;;  %v724_v1 = vmul.f32 %v720_v51, %v714_v58 }
 0x14b   : > { %v821_v3 = vpack.c.bf16 %v723_v0, %v707_v62  ;;  %v822_v4 = vpack.c.bf16 %v724_v1, %v708_v63 }
 0x14d   : > { %850 = vmatpush.bf16.msrb.mxu2 %v821_v3  ;;  %863 = vmatpush.bf16.msra.mxu3 %v822_v4 }
 0x14f   : > { %v881_v14 = vpop.permute.xlu1 %880 }
 0x150   : > { %1745 = vmatmul.msk.bf16.vlgmr.msrb.gmra.mxu2 %vm832_vm10, %v831_v5  ;;  %1746 = vmatmul.msk.bf16.vlgmr.msra.gmra.mxu3 %vm832_vm10, %v831_v5  ;;  %v1003_v1 = vpop.permute.xlu0 %1002 }
 0x157   : > { %v1008_v62 = vpop.permute.xlu1 %1007 }
 0x158   : > { %v993_v22 = vpop.permute.xlu0 %992 }
 0x192   : > { %v966_v46 = vpop.permute.xlu2 %965 }
 0x1d3   : > { %v852_v10 = vpop.f32.mrf.mxu2  ;;  %v865_v11 = vpop.f32.mrf.mxu3 }
 0x1d4   : > { %v875_v12 = vmul.f32 %v873_v8, %v852_v10  ;;  %v876_v13 = vmul.f32 %v873_v8, %v865_v11 }
 0x1d6   : > { %v883_v19 = vadd.f32 %v881_v14, %v875_v12  ;;  %v884_v20 = vadd.f32 %v881_v14, %v876_v13  ;;  %v961_v12 = vpop.permute.xlu1 %960 }
 0x1d8   : > { %v885_v26 = vmax.f32 %v883_v19, 0.0  ;;  %v886_v27 = vmax.f32 %v884_v20, 0.0 }
 0x1da   : > { %v891_v16 = vpack.c.bf16 %v885_v26, %v885_v26  ;;  %v892_v21 = vpack.c.bf16 %v886_v27, %v886_v27 }
 0x1db   : > { %v854_v29 = vpop.f32.mrf.mxu2  ;;  %v867_v30 = vpop.f32.mrf.mxu3 }
 0x1dc   : > { %v911_v32 = vsel %vm836_vm5, %v891_v16, 0  ;;  %v914_v33 = vsel %vm836_vm5, %v892_v21, 0  ;;  %vm1314_vm5 = vcmask 1040384  }
 0x1dd   : > { %923 = vmatpush.bf16.msra.mxu0 %v911_v32  ;;  %942 = vmatpush.bf16.msrb.mxu1 %v914_v33 }
 0x1e0   : > { %1755 = vmatmul.msk.bf16.vlgmr.msra.gmra.mxu0 %vm903_vm11, %v1787_v39  ;;  %1757 = vmatmul.msk.bf16.vlgmr.msrb.gmra.mxu1 %vm903_vm11, %v1787_v39 }
 0x1e1   : > { %1524 = vmatpush.bf16.msrb.mxu0 %v2144_v6  ;;  %1543 = vmatpush.bf16.msra.mxu1 %v2149_v9  ;;  %v998_v9 = vpop.permute.xlu2 %997 }
 0x1f0   : > { %1756 = vmatmul.msk.bf16.gmra.mxu0 %vm903_vm11, %v1788_v44  ;;  %1758 = vmatmul.msk.bf16.gmra.mxu1 %vm903_vm11, %v1788_v44 }
 0x25d   : > { %v925_v54 = vpop.f32.mrf.mxu0  ;;  %v944_v55 = vpop.f32.mrf.mxu1 }
 0x25e   : > { %v978_v13 = vmul.f32 %v961_v12, %v925_v54  ;;  %v979_v14 = vmul.f32 %v961_v12, %v944_v55  ;;  %v1065_v54 = vld [vmem:[%s2724_s15 + $0x18] sm:$0xff]  ;;  %v1064_v55 = vld [vmem:[%s2724_s15 + $0x10] sm:$0xff] }
 0x260   : > { %v2389_v16 = vadd.f32 %v993_v22, %v978_v13  ;;  %v2391_v21 = vadd.f32 %v993_v22, %v979_v14 }
 0x262   : > { %v1018_v39 = vadd.f32 %v2391_v21, %v2389_v16 }
 0x265   : > { %v927_v57 = vpop.f32.mrf.mxu0  ;;  %v946_v58 = vpop.f32.mrf.mxu1 }
 0x266   : > { %v980_v61 = vmul.f32 %v966_v46, %v927_v57  ;;  %v981_v6 = vmul.f32 %v966_v46, %v946_v58  ;;  %v1063_v57 = vld [vmem:[%s2724_s15 + $0x8] sm:$0xff]  ;;  %v1062_v58 = vld [vmem:[%s2724_s15] sm:$0xff] }
 0x268   : > { %v2375_v63 = vadd.f32 %v998_v9, %v980_v61  ;;  %v2377_v0 = vadd.f32 %v998_v9, %v981_v6  ;;  %v1139_v61 = vld [vmem:[%s2726_s17 + $0x18] sm:$0xff]  ;;  %v1137_v6 = vld [vmem:[%s2726_s17 + $0x8] sm:$0xff]  ;;  %v1966_v9 = vmov 256.0  }
 0x269   : > { %1865 = vrcp.f32 %v1966_v9 }
 0x26a   : > { %v1021_v3 = vadd.f32 %v2377_v0, %v2375_v63  ;;  %v1044_v46 = vmax.f32 %v2375_v63, %v2377_v0 }
 0x26c   : > { %1022 = vadd.xlane.f32.xlu2 %v1021_v3 }
 0x26d   : > { %v930_v4 = vpop.f32.mrf.mxu0  ;;  %v949_v5 = vpop.f32.mrf.mxu1 }
 0x26e   : > { %v982_v7 = vmul.f32 %v971_v56, %v930_v4  ;;  %v983_v8 = vmul.f32 %v971_v56, %v949_v5  ;;  %v1136_v56 = vld [vmem:[%s2726_s17] sm:$0xff] }
 0x270   : > { %v2381_v10 = vadd.f32 %v1003_v1, %v982_v7  ;;  %v2383_v11 = vadd.f32 %v1003_v1, %v983_v8  ;;  %v1866_v1 = vpop.eup %1865 }
 0x271   : > { %v1031_v3 = vmul.f32 256.0, %v1866_v1  ;;  %vm1035_vm12 = vweird.f32 %v1866_v1 }
 0x272   : > { %v1047_v19 = vmax.f32 %v2381_v10, %v2383_v11  ;;  %v1024_v20 = vadd.f32 %v2383_v11, %v2381_v10 }
 0x273   : > { %v1032_v5 = vsub.f32 1.0, %v1031_v3 }
 0x274   : > { %1048 = vmax.xlane.f32.xlu1 %v1047_v19  ;;  %1025 = vadd.xlane.f32.xlu2 %v1024_v20 }
 0x275   : > { %v932_v26 = vpop.f32.mrf.mxu0  ;;  %v951_v27 = vpop.f32.mrf.mxu1  ;;  %v1033_v8 = vmul.f32 %v1866_v1, %v1032_v5 }
 0x276   : > { %v984_v29 = vmul.f32 %v976_v45, %v932_v26  ;;  %v985_v30 = vmul.f32 %v976_v45, %v951_v27  ;;  %v1041_v45 = vmax.f32 %v2389_v16, %v2391_v21 }
 0x277   : > { %v1034_v13 = vadd.f32 %v1866_v1, %v1033_v8 }
 0x278   : > { %v2393_v32 = vadd.f32 %v1008_v62, %v984_v29  ;;  %v2395_v33 = vadd.f32 %v1008_v62, %v985_v30  ;;  %v1138_v62 = vld [vmem:[%s2726_s17 + $0x10] sm:$0xff] }
 0x279   : > { %v1036_v19 = vsel %vm1035_vm12, %v1866_v1, %v1034_v13 }
 0x27a   : > { %v1050_v41 = vmax.f32 %v2393_v32, %v2395_v33  ;;  %v1027_v44 = vadd.f32 %v2395_v33, %v2393_v32 }
 0x27c   : > { %1019 = vadd.xlane.f32.xlu2 %v1018_v39  ;;  %1051 = vmax.xlane.f32.xlu0 %v1050_v41 }
 0x27d   : > { %1028 = vadd.xlane.f32.xlu1 %v1027_v44 }
 0x284   : > { %1045 = vmax.xlane.f32.xlu0 %v1044_v46 }
 0x285   : > { %1042 = vmax.xlane.f32.xlu1 %v1041_v45 }
 0x294   : > { %1083 = vperm.xlu2 %1853, %v1065_v54   ;;  %v1058_v54 = vld [vmem:[%s2723_s14] sm:$0xff] }
 0x298   : > { %1078 = vperm.xlu0 %1851, %v1064_v55  }
 0x29c   : > { %1142 = vperm.xlu2 %1853, %v1136_v56   ;;  %v1059_v56 = vld [vmem:[%s2723_s14 + $0x8] sm:$0xff] }
 0x29e   : > { %1073 = vperm.xlu1 %1852, %v1063_v57   ;;  %v1060_v57 = vld [vmem:[%s2723_s14 + $0x10] sm:$0xff] }
 0x2a0   : > { %1068 = vperm.xlu0 %1851, %v1062_v58   ;;  %v1061_v58 = vld [vmem:[%s2723_s14 + $0x18] sm:$0xff] }
 0x2a4   : > { %1157 = vperm.xlu2 %1853, %v1139_v61  }
 0x2a6   : > { %1147 = vperm.xlu1 %1852, %v1137_v6  }
 0x2a8   : > { %1152 = vperm.xlu0 %1851, %v1138_v62  }
 0x2df   : > { %v1023_v4 = vpop.xlane.xlu2 %1022 }
 0x2e0   : > { %v1038_v39 = vmul.f32 %v1036_v19, %v1023_v4 }
 0x2e7   : > { %v1049_v7 = vpop.xlane.xlu1 %1048  ;;  %v1026_v12 = vpop.xlane.xlu2 %1025 }
 0x2e8   : > { %v1039_v22 = vmul.f32 %v1036_v19, %v1026_v12 }
 0x2ea   : > { %v1056_v30 = vsel %vm1053_vm13, %v1039_v22, %v1049_v7 }
 0x2ef   : > { %v1052_v14 = vpop.xlane.xlu0 %1051  ;;  %v1020_v29 = vpop.xlane.xlu2 %1019 }
 0x2f0   : > { %v1029_v20 = vpop.xlane.xlu1 %1028  ;;  %v1037_v44 = vmul.f32 %v1036_v19, %v1020_v29  ;;  %v1134_v29 = vld [vmem:[%s2725_s16 + $0x10] sm:$0xff] }
 0x2f1   : > { %v1040_v26 = vmul.f32 %v1036_v19, %v1029_v20 }
 0x2f3   : > { %v1057_v27 = vsel %vm1053_vm13, %v1040_v26, %v1052_v14  ;;  %v1132_v26 = vld [vmem:[%s2725_s16] sm:$0xff] }
 0x2f4   : > { %1111 = vmatpush.msra.mxu2 %v1057_v27  ;;  %v1133_v27 = vld [vmem:[%s2725_s16 + $0x8] sm:$0xff] }
 0x2f6   : > { %1112 = vmatpush.msra.mxu2 %v1056_v30  ;;  %v1135_v30 = vld [vmem:[%s2725_s16 + $0x18] sm:$0xff] }
 0x2f7   : > { %v1046_v41 = vpop.xlane.xlu0 %1045  ;;  %v1084_v1 = vpop.permute.xlu2 %1083 }
 0x2f8   : > { %v1043_v46 = vpop.xlane.xlu1 %1042  ;;  %v1055_v45 = vsel %vm1053_vm13, %v1038_v39, %v1046_v41 }
 0x2f9   : > { %1113 = vmatpush.msra.mxu2 %v1055_v45  ;;  %v1054_v55 = vsel %vm1053_vm13, %v1037_v44, %v1043_v46 }
 0x2fb   : > { %1114 = vmatpush.msra.mxu2 %v1054_v55 }
 0x2fc   : > { %1759 = vmatmul.msk.f32.vlgmr.msra.gmra.mxu2 %vm1086_vm14, %v1058_v54 }
 0x2ff   : > { %v1143_v39 = vpop.permute.xlu2 %1142 }
 0x304   : > { %1760 = vmatmul.msk.f32.gmra.mxu2 %vm1086_vm14, %v1059_v56 }
 0x30a   : > { %v1079_v9 = vpop.permute.xlu0 %1078 }
 0x30c   : > { %1761 = vmatmul.msk.f32.gmra.mxu2 %vm1086_vm14, %v1060_v57 }
 0x310   : > { %v1074_v7 = vpop.permute.xlu1 %1073 }
 0x312   : > { %v1069_v13 = vpop.permute.xlu0 %1068 }
 0x314   : > { %1762 = vmatmul.msk.f32.gmra.mxu2 %vm1086_vm14, %v1061_v58  ;;  %v1158_v58 = vpop.permute.xlu2 %1157 }
 0x318   : > { %v1148_v46 = vpop.permute.xlu1 %1147 }
 0x31a   : > { %v1153_v55 = vpop.permute.xlu0 %1152 }
 0x37f   : > { %v1116_v61 = vpop.f32.mrf.mxu2 }
 0x380   : > { %v1117_v14 = vadd.f32 %v1116_v61, %v1069_v13 }
 0x382   : > { %v1128_v22 = vmax.f32 %v1117_v14, 0.0 }
 0x387   : > { %v1119_v6 = vpop.f32.mrf.mxu2 }
 0x388   : > { %v1120_v8 = vadd.f32 %v1119_v6, %v1074_v7 }
 0x38a   : > { %v1129_v20 = vmax.f32 %v1120_v8, 0.0 }
 0x38f   : > { %v1122_v62 = vpop.f32.mrf.mxu2 }
 0x390   : > { %v1123_v4 = vadd.f32 %v1122_v62, %v1079_v9 }
 0x392   : > { %v1130_v19 = vmax.f32 %v1123_v4, 0.0 }
 0x397   : > { %v1125_v3 = vpop.f32.mrf.mxu2 }
 0x398   : > { %v1126_v5 = vadd.f32 %v1125_v3, %v1084_v1 }
 0x39a   : > { %v1131_v12 = vmax.f32 %v1126_v5, 0.0 }
 0x39c   : > { %1184 = vmatpush.msrb.mxu3 %v1131_v12 }
 0x39e   : > { %1185 = vmatpush.msrb.mxu3 %v1130_v19 }
 0x3a0   : > { %1186 = vmatpush.msrb.mxu3 %v1129_v20 }
 0x3a2   : > { %1187 = vmatpush.msrb.mxu3 %v1128_v22 }
 0x3a3   : > { %1763 = vmatmul.msk.f32.vlgmr.msrb.gmra.mxu3 %vm1086_vm14, %v1132_v26 }
 0x3ab   : > { %1764 = vmatmul.msk.f32.gmra.mxu3 %vm1086_vm14, %v1133_v27 }
 0x3b3   : > { %1765 = vmatmul.msk.f32.gmra.mxu3 %vm1086_vm14, %v1134_v29 }
 0x3bb   : > { %1766 = vmatmul.msk.f32.gmra.mxu3 %vm1086_vm14, %v1135_v30 }
 0x426   : > { %v1189_v41 = vpop.f32.mrf.mxu3 }
 0x427   : > { %v1190_v44 = vadd.f32 %v1189_v41, %v1143_v39  ;;  %v2470_v39 = vld [vmem:[%s2727_s18] sm:$0x3] }
 0x429   : > { %1205 = vrot.lane.b32.xlu1 %v1190_v44, %s2770_s1 }
 0x42e   : > { %v1192_v45 = vpop.f32.mrf.mxu3 }
 0x42f   : > { %v1193_v54 = vadd.f32 %v1192_v45, %v1148_v46  ;;  %v1967_v46 = vmov 4  }
 0x431   : > { %1207 = vrot.lane.b32.xlu0 %v1193_v54, %s2770_s1 }
 0x436   : > { %v1195_v56 = vpop.f32.mrf.mxu3 }
 0x437   : > { %v1196_v57 = vadd.f32 %v1195_v56, %v1153_v55 }
 0x439   : > { %1209 = vrot.lane.b32.xlu2 %v1196_v57, %s2770_s1 }
 0x43e   : > { %v1198_v61 = vpop.f32.mrf.mxu3 }
 0x43f   : > { %v1199_v6 = vadd.f32 %v1198_v61, %v1158_v58 }
 0x441   : > { %1211 = vrot.lane.b32.xlu1 %v1199_v6, %s2770_s1 }
 0x493   : > { %v1210_v62 = vpop.permute.xlu2 %1209 }
 0x494   : > { %v1219_v9 = vadd.f32 %v1210_v62, %v1196_v57 }
 0x496   : > { %v1223_v1 = vsub.f32 0.0, %v1219_v9  ;;  %v1968_v9 = vmov 2  }
 0x498   : > { %v1229_v3 = vmul.f32 1.442695, %v1223_v1  ;;  %v1969_v1 = vmov 3  }
 0x49a   : > { %1867 = vpow2.f32 %v1229_v3  ;;  %v1970_v3 = vmov 1  }
 0x49b   : > { %v1206_v4 = vpop.permute.xlu1 %1205 }
 0x49c   : > { %v1217_v5 = vadd.f32 %v1206_v4, %v1190_v44  ;;  %v1972_v4 = vmov 6  }
 0x49e   : > { %v1221_v7 = vsub.f32 0.0, %v1217_v5  ;;  %v1973_v5 = vmov 32.0  }
 0x4a0   : > { %v1868_v8 = vpop.eup %1867  ;;  %v1225_v12 = vmul.f32 1.442695, %v1221_v7 }
 0x4a1   : > { %v1235_v13 = vadd.f32 1.0, %v1868_v8 }
 0x4a2   : > { %1869 = vpow2.f32 %v1225_v12 }
 0x4a3   : > { %1871 = vrcp.f32 %v1235_v13  ;;  %v1208_v14 = vpop.permute.xlu0 %1207 }
 0x4a4   : > { %v1218_v19 = vadd.f32 %v1208_v14, %v1193_v54 }
 0x4a6   : > { %v1222_v20 = vsub.f32 0.0, %v1218_v19 }
 0x4a8   : > { %v1870_v22 = vpop.eup %1869  ;;  %v1227_v26 = vmul.f32 1.442695, %v1222_v20 }
 0x4a9   : > { %v1872_v27 = vpop.eup %1871  ;;  %v1233_v29 = vadd.f32 1.0, %v1870_v22 }
 0x4aa   : > { %1873 = vpow2.f32 %v1227_v26  ;;  %1253 = vperm.xlu1 %1852, %v1872_v27  }
 0x4ab   : > { %1875 = vrcp.f32 %v1233_v29 }
 0x4b0   : > { %v1874_v30 = vpop.eup %1873 }
 0x4b1   : > { %v1876_v41 = vpop.eup %1875  ;;  %v1234_v44 = vadd.f32 1.0, %v1874_v30 }
 0x4b2   : > { %1243 = vperm.xlu0 %1851, %v1876_v41   ;;  %1858 = vset.pattern.permute.xlu1 %v1967_v46 }
 0x4b3   : > { %1877 = vrcp.f32 %v1234_v44  ;;  %v1212_v45 = vpop.permute.xlu1 %1211  ;;  %1384 = vperm.xlu1 %1858, %v2470_v39  }
 0x4b4   : > { %v1220_v54 = vadd.f32 %v1212_v45, %v1199_v6  ;;  %v1971_v6 = vmov 5  }
 0x4b6   : > { %v1224_v55 = vsub.f32 0.0, %v1220_v54 }
 0x4b8   : > { %v1231_v56 = vmul.f32 1.442695, %v1224_v55 }
 0x4b9   : > { %v1878_v57 = vpop.eup %1877 }
 0x4ba   : > { %1879 = vpow2.f32 %v1231_v56  ;;  %1248 = vperm.xlu2 %1853, %v1878_v57  }
 0x4bb   : > { %1859 = vset.pattern.permute.xlu1 %v1971_v6 }
 0x4bc   : > { %1400 = vperm.xlu1 %1859, %v2470_v39  }
 0x4c0   : > { %v1880_v58 = vpop.eup %1879 }
 0x4c1   : > { %v1236_v61 = vadd.f32 1.0, %v1880_v58 }
 0x4c2   : > { %1856 = vset.pattern.permute.xlu2 %v1968_v9 }
 0x4c3   : > { %1881 = vrcp.f32 %v1236_v61  ;;  %1360 = vperm.xlu2 %1856, %v2470_v39  }
 0x4c4   : > { %1883 = vrcp.f32 %v1973_v5 }
 0x4c9   : > { %v1882_v62 = vpop.eup %1881 }
 0x4ca   : > { %1258 = vperm.xlu0 %1851, %v1882_v62   ;;  %v1884_v14 = vpop.eup %1883 }
 0x4cb   : > { %1857 = vset.pattern.permute.xlu2 %v1969_v1  ;;  %v1306_v29 = vmul.f32 32.0, %v1884_v14  ;;  %vm1310_vm15 = vweird.f32 %v1884_v14 }
 0x4cc   : > { %1376 = vperm.xlu2 %1857, %v2470_v39  }
 0x4cd   : > { %v1307_v45 = vsub.f32 1.0, %v1306_v29 }
 0x4cf   : > { %v1308_v61 = vmul.f32 %v1884_v14, %v1307_v45 }
 0x4d2   : > { %1854 = vset.pattern.permute.xlu0 %v1970_v3 }
 0x4d3   : > { %1344 = vperm.xlu0 %1854, %v2470_v39  }
 0x4d4   : > { %1860 = vset.pattern.permute.xlu2 %v1972_v4 }
 0x4d5   : > { %1416 = vperm.xlu2 %1860, %v2470_v39  }
 0x4db   : > { %1855 = vset.pattern.permute.xlu0 %v1957_v2 }
 0x4dc   : > { %1328 = vperm.xlu0 %1855, %v2470_v39  }
 0x514   : > { %v1249_v8 = vpop.permute.xlu2 %1248 }
 0x515   : > { %v2487_v19 = vmul.f32 %v1249_v8, %v2375_v63  ;;  %v2490_v20 = vmul.f32 %v1249_v8, %v2377_v0  ;;  %v1309_v8 = vadd.f32 %v1884_v14, %v1308_v61 }
 0x517   : > { %v1311_v45 = vsel %vm1310_vm15, %v1884_v14, %v1309_v8  ;;  %v1790_v14 = vld [vmem:[%s2720_s11 + $0x8] sm:$0xff]  ;;  %v1557_v8 = vld [vmem:[%s2721_s12 + $0x10] sm:$0xff] }
 0x51c   : > { %v1254_v22 = vpop.permute.xlu1 %1253 }
 0x524   : > { %v1244_v7 = vpop.permute.xlu0 %1243 }
 0x525   : > { %v2481_v12 = vmul.f32 %v1244_v7, %v2389_v16  ;;  %v2484_v13 = vmul.f32 %v1244_v7, %v2391_v21  ;;  %v2497_v16 = vmul.f32 %v1254_v22, %v2381_v10  ;;  %v2500_v21 = vmul.f32 %v1254_v22, %v2383_v11 }
 0x527   : > { %v1287_v26 = vadd.f32 %v2487_v19, %v2481_v12  ;;  %v1296_v27 = vadd.f32 %v2490_v20, %v2484_v13  ;;  %v1269_v46 = vmax.f32 %v2481_v12, %v2497_v16  ;;  %v1278_v10 = vmax.f32 %v2484_v13, %v2500_v21 }
 0x529   : > { %v1288_v41 = vadd.f32 %v1287_v26, %v2497_v16  ;;  %v1297_v44 = vadd.f32 %v1296_v27, %v2500_v21 }
 0x53c   : > { %v1259_v30 = vpop.permute.xlu0 %1258 }
 0x53d   : > { %v2503_v63 = vmul.f32 %v1259_v30, %v2393_v32  ;;  %v2506_v0 = vmul.f32 %v1259_v30, %v2395_v33 }
 0x53f   : > { %v1270_v11 = vmax.f32 %v2487_v19, %v2503_v63  ;;  %v1279_v32 = vmax.f32 %v2490_v20, %v2506_v0  ;;  %v1289_v33 = vadd.f32 %v1288_v41, %v2503_v63  ;;  %v1298_v54 = vadd.f32 %v1297_v44, %v2506_v0 }
 0x541   : > { %v1271_v55 = vmax.f32 %v1269_v46, %v1270_v11  ;;  %v1280_v56 = vmax.f32 %v1278_v10, %v1279_v32  ;;  %v1290_v57 = vrot.slane %v1289_v33, 4  ;;  %v1299_v58 = vrot.slane %v1298_v54, 4  ;;  %v1789_v10 = vld [vmem:[%s2720_s11] sm:$0xff] }
 0x542   : > { %1775 = vmatmul.msk.bf16.vlgmr.msrb.gmra.mxu0 %vm644_vm0, %v1789_v10  ;;  %1777 = vmatmul.msk.bf16.vlgmr.msra.gmra.mxu1 %vm644_vm0, %v1789_v10 }
 0x543   : > { %v1272_v62 = vrot.slane %v1271_v55, 4  ;;  %v1281_v9 = vrot.slane %v1280_v56, 4  ;;  %v1291_v1 = vadd.f32 %v1290_v57, %v1289_v33  ;;  %v1300_v3 = vadd.f32 %v1299_v58, %v1298_v54 }
 0x545   : > { %v1273_v6 = vmax.f32 %v1271_v55, %v1272_v62  ;;  %v1282_v4 = vmax.f32 %v1280_v56, %v1281_v9  ;;  %v1292_v5 = vrot.slane %v1291_v1, 2  ;;  %v1301_v7 = vrot.slane %v1300_v3, 2 }
 0x546   : > { %v1974_v9 = vmov 8  }
 0x547   : > { %v1274_v22 = vrot.slane %v1273_v6, 2  ;;  %v1283_v26 = vrot.slane %v1282_v4, 2  ;;  %v1293_v27 = vadd.f32 %v1292_v5, %v1291_v1  ;;  %v1302_v29 = vadd.f32 %v1301_v7, %v1300_v3  ;;  %1862 = vset.pattern.permute.xlu1 %v1974_v9  ;;  %v1470_v3 = vld [vmem:[#allocation2] sm:$0x1]  ;;  %v1590_v5 = vld [vmem:[%s2722_s13 + $0x18] sm:$0xff]  ;;  %v1556_v7 = vld [vmem:[%s2721_s12 + $0x8] sm:$0xff] }
 0x548   : > { %v1975_v1 = vmov 7  }
 0x549   : > { %v1275_v30 = vmax.f32 %v1273_v6, %v1274_v22  ;;  %v1284_v41 = vmax.f32 %v1282_v4, %v1283_v26  ;;  %v1294_v44 = vrot.slane %v1293_v27, 1  ;;  %v1303_v46 = vrot.slane %v1302_v29, 1  ;;  %1861 = vset.pattern.permute.xlu2 %v1975_v1  ;;  %v1587_v6 = vld [vmem:[%s2722_s13] sm:$0xff]  ;;  %v1588_v22 = vld [vmem:[%s2722_s13 + $0x8] sm:$0xff]  ;;  %v1589_v26 = vld [vmem:[%s2722_s13 + $0x10] sm:$0xff] }
 0x54a   : > { %v1555_v4 = vld [vmem:[%s2721_s12] sm:$0xff] }
 0x54b   : > { %v1276_v11 = vrot.slane %v1275_v30, 1  ;;  %v1285_v32 = vrot.slane %v1284_v41, 1  ;;  %v1295_v33 = vadd.f32 %v1294_v44, %v1293_v27  ;;  %v1304_v54 = vadd.f32 %v1303_v46, %v1302_v29  ;;  %v1361_v27 = vpop.permute.xlu2 %1360 }
 0x54d   : > { %v1277_v55 = vmax.f32 %v1275_v30, %v1276_v11  ;;  %v1286_v56 = vmax.f32 %v1284_v41, %v1285_v32  ;;  %v1312_v57 = vmul.f32 %v1311_v45, %v1295_v33  ;;  %v1313_v58 = vmul.f32 %v1311_v45, %v1304_v54  ;;  %v1345_v30 = vpop.permute.xlu0 %1344 }
 0x54f   : > { %v2525_v61 = vsel %vm1314_vm5, %v1277_v55, %v1312_v57  ;;  %v2527_v62 = vsel %vm1314_vm5, %v1286_v56, %v1313_v58 }
 0x550   : > { %1369 = vrot.lane.b32.xlu0 %v2527_v62, %s2771_s4  ;;  %1319 = vrot.lane.b32.xlu1 %v2527_v62, %s2772_s27 }
 0x551   : > { %1317 = vrot.lane.b32.xlu2 %v2525_v61, %s2772_s27 }
 0x552   : > { %1776 = vmatmul.msk.bf16.gmra.mxu0 %vm644_vm0, %v1790_v14  ;;  %1778 = vmatmul.msk.bf16.gmra.mxu1 %vm644_vm0, %v1790_v14  ;;  %vm1455_vm0 = vcmask 1041408  }
 0x553   : > { %v1377_v29 = vpop.permute.xlu2 %1376 }
 0x555   : > { %v1329_v46 = vpop.permute.xlu0 %1328 }
 0x558   : > { %1337 = vrot.lane.b32.xlu1 %v2527_v62, %s2773_s28  ;;  %1391 = vrot.lane.b32.xlu0 %v2525_v61, %s2770_s1 }
 0x559   : > { %1335 = vrot.lane.b32.xlu2 %v2525_v61, %s2773_s28 }
 0x55b   : > { %v2594_v41 = vpop.permute.xlu2 %1416 }
 0x560   : > { %1353 = vrot.lane.b32.xlu1 %v2527_v62, %s2774_s22  ;;  %1407 = vrot.lane.b32.xlu0 %v2525_v61, %s2775_s0 }
 0x561   : > { %1351 = vrot.lane.b32.xlu2 %v2525_v61, %s2774_s22 }
 0x568   : > { %1425 = vrot.lane.b32.xlu0 %v2527_v62, %s2776_s21  ;;  %1367 = vrot.lane.b32.xlu1 %v2525_v61, %s2771_s4  ;;  %s1791_s4 = sshll.u32 %s2106_s19, 6 }
 0x569   : > { %1393 = vrot.lane.b32.xlu2 %v2527_v62, %s2770_s1  ;;  %s1655_s26 = scalar_lea.hbm %s2729_s20, %s1791_s4 }
 0x56a   : > { %s1658_s22 = sshll.u32 %s1655_s26, 4  ;;  %s1913_s26 = scalar_lea.hbm %s2729_s20, 128  ;;  %s1659_s22 = int_to_ptr.hbm [resolvable:$true] %s1658_s22 }
 0x570   : > { %1441 = vrot.lane.b32.xlu0 %v2527_v62, %s2777_s2  ;;  %1423 = vrot.lane.b32.xlu1 %v2525_v61, %s2776_s21  ;;  %s622_s21 = sand.u32 1, %s1947_s24  }
 0x571   : > { %1409 = vrot.lane.b32.xlu2 %v2527_v62, %s2775_s0  ;;  %s1644_s0 = scalar_lea.sflag [#allocation4], %s622_s21 }
 0x578   : > { %1473 = vperm.xlu0 %1855, %v1470_v3   ;;  %1439 = vrot.lane.b32.xlu1 %v2525_v61, %s2777_s2  ;;  %s1725_s2 = sshll.u32 %s622_s21, 6 }
 0x579   : > { %1432 = vperm.xlu2 %1861, %v2470_v39   ;;  %s624_s30 = scalar_lea.vmem [#allocation3], %s1725_s2  ;;  %s1907_s2 = sshra.s32 %s1659_s22, 4  ;;  %s1908_s2 = int_to_ptr.hbm [resolvable:$true] %s1907_s2 }
 0x57a   : > { %s1656_s19 = sshll.u32 %s624_s30, 4  ;;  %s1909_s4 = scalar_lea.hbm %s1908_s2, 64  ;;  %s1657_s19 = int_to_ptr.vmem [resolvable:$true] %s1656_s19 }
 0x57b   : > { %p1910_p11 = scmp.ne.s32.totalorder %s1908_s2, %s1909_s4  ;;  %p1914_p0 = scmp.lt.s32.totalorder %s1908_s2, %s2729_s20 }
 0x57c   : > { %p1915_p1 = scmp.lt.s32.totalorder %s1913_s26, %s1909_s4 }
 0x57d   : > { %p1911_p12 = pnand %p1910_p11, %p2123_p5 }
 0x57e   : > { %p1916_p2 = por %p1915_p1, %p1914_p0 }
 0x57f   : > { %p1912_p13 = pneg %p1911_p12 }
 0x580   : > { %1593 = vperm.xlu0 %1855, %v1587_v6   ;;  %1448 = vperm.xlu1 %1862, %v2470_v39   ;;  %v1558_v39 = vld [vmem:[%s2721_s12 + $0x18] sm:$0xff] }
 0x581   : > { %1863 = vset.pattern.permute.xlu2 %v1957_v2  ;;  %p1917_p3 = pnand %p1916_p2, %p1912_p13 }
 0x582   : > { %1561 = vperm.xlu2 %1863, %v1555_v4  }
 0x588   : > { %1608 = vperm.xlu0 %1855, %v1590_v5   ;;  %1864 = vset.pattern.permute.xlu1 %v1957_v2  ;;  %v1385_v2 = vpop.permute.xlu1 %1384 }
 0x589   : > { %1566 = vperm.xlu1 %1864, %v1556_v7  }
 0x58a   : > { %1571 = vperm.xlu2 %1863, %v1557_v8  }
 0x590   : > { %v1401_v44 = vpop.permute.xlu1 %1400 }
 0x591   : > { %1576 = vperm.xlu1 %1864, %v1558_v39  }
 0x592   : > { %1598 = vperm.xlu2 %1863, %v1588_v22  }
 0x599   : > { %1603 = vperm.xlu1 %1864, %v1589_v26  }
 0x5ab   : > { %v1318_v10 = vpop.permute.xlu2 %1317 }
 0x5b3   : > { %v1336_v32 = vpop.permute.xlu2 %1335 }
 0x5bb   : > { %v1352_v55 = vpop.permute.xlu2 %1351 }
 0x5c2   : > { %v1320_v45 = vpop.permute.xlu1 %1319  ;;  %v1370_v11 = vpop.permute.xlu0 %1369 }
 0x5c3   : > { %v1321_v14 = vsel %vm698_vm8, %v1318_v10, %v1320_v45  ;;  %v1322_v9 = vsel %vm698_vm8, %v1320_v45, %v1318_v10  ;;  %v1394_v26 = vpop.permute.xlu2 %1393 }
 0x5c4   : > { %v1323_v5 = vmul.f32 %v1322_v9, %v703_v48  ;;  %v1324_v7 = vmul.f32 %v1321_v14, %v704_v49 }
 0x5ca   : > { %v1338_v33 = vpop.permute.xlu1 %1337  ;;  %v1392_v54 = vpop.permute.xlu0 %1391 }
 0x5cb   : > { %v1339_v57 = vsel %vm713_vm9, %v1336_v32, %v1338_v33  ;;  %v1340_v58 = vsel %vm713_vm9, %v1338_v33, %v1336_v32  ;;  %v1410_v9 = vpop.permute.xlu2 %1409 }
 0x5cc   : > { %v1341_v6 = vmul.f32 %v1340_v58, %v719_v50  ;;  %v1342_v4 = vmul.f32 %v1339_v57, %v720_v51  ;;  %v1332_v51 = vmul.f32 %v1329_v46, %v1324_v7  ;;  %v1395_v58 = vsel %vm761_vm4, %v1392_v54, %v1394_v26 }
 0x5ce   : > { %v1347_v45 = vmul.f32 %v1345_v30, %v1341_v6  ;;  %v1348_v50 = vmul.f32 %v1345_v30, %v1342_v4 }
 0x5d0   : > { %v1350_v33 = vadd.f32 %v1348_v50, %v1332_v51  ;;  %v1526_v51 = vpop.f32.mrf.mxu0 }
 0x5d2   : > { %v1354_v56 = vpop.permute.xlu1 %1353  ;;  %v1408_v8 = vpop.permute.xlu0 %1407 }
 0x5d3   : > { %v1355_v1 = vsel %vm729_vm7, %v1352_v55, %v1354_v56  ;;  %v1356_v3 = vsel %vm729_vm7, %v1354_v56, %v1352_v55 }
 0x5d4   : > { %v1357_v39 = vmul.f32 %v1356_v3, %v735_v24  ;;  %v1358_v22 = vmul.f32 %v1355_v1, %v736_v25  ;;  %v1331_v24 = vmul.f32 %v1329_v46, %v1323_v5  ;;  %v1387_v46 = vmul.f32 %v1385_v2, %v2525_v61 }
 0x5d5   : > { %v1411_v3 = vsel %vm777_vm3, %v1408_v8, %v1410_v9 }
 0x5d6   : > { %v1363_v17 = vmul.f32 %v1361_v27, %v1357_v39  ;;  %v1364_v25 = vmul.f32 %v1361_v27, %v1358_v22  ;;  %v1349_v32 = vadd.f32 %v1347_v45, %v1331_v24  ;;  %v1388_v27 = vmul.f32 %v1385_v2, %v2527_v62 }
 0x5d7   : > { %v1413_v47 = vmul.f32 %v1411_v3, %v783_v52 }
 0x5d8   : > { %v1365_v56 = vadd.f32 %v1363_v17, %v1349_v32  ;;  %v1366_v57 = vadd.f32 %v1364_v25, %v1350_v33  ;;  %v1545_v17 = vpop.f32.mrf.mxu1 }
 0x5da   : > { %v1368_v10 = vpop.permute.xlu1 %1367  ;;  %v1426_v14 = vpop.permute.xlu0 %1425 }
 0x5db   : > { %v1371_v28 = vsel %vm745_vm6, %v1368_v10, %v1370_v11  ;;  %v1372_v48 = vsel %vm745_vm6, %v1370_v11, %v1368_v10  ;;  %v1396_v11 = vsel %vm761_vm4, %v1394_v26, %v1392_v54  ;;  %v1412_v54 = vsel %vm777_vm3, %v1410_v9, %v1408_v8  ;;  %v1433_v26 = vpop.permute.xlu2 %1432 }
 0x5dc   : > { %v1373_v31 = vmul.f32 %v1372_v48, %v751_v18  ;;  %v1374_v49 = vmul.f32 %v1371_v28, %v752_v23  ;;  %v1398_v1 = vmul.f32 %v1396_v11, %v768_v60  ;;  %v1419_v10 = vmul.f32 %v2594_v41, %v1413_v47  ;;  %v1528_v11 = vpop.f32.mrf.mxu0 }
 0x5de   : > { %v1379_v55 = vmul.f32 %v1377_v29, %v1373_v31  ;;  %v1380_v30 = vmul.f32 %v1377_v29, %v1374_v49  ;;  %v1397_v29 = vmul.f32 %v1395_v58, %v767_v59  ;;  %v1404_v2 = vmul.f32 %v1401_v44, %v1398_v1 }
 0x5df   : > { %v1414_v59 = vmul.f32 %v1412_v54, %v784_v53 }
 0x5e0   : > { %v1381_v15 = vadd.f32 %v1379_v55, %v1365_v56  ;;  %v1382_v23 = vadd.f32 %v1380_v30, %v1366_v57  ;;  %v1403_v62 = vmul.f32 %v1401_v44, %v1397_v29 }
 0x5e1   : > { %v1420_v44 = vmul.f32 %v2594_v41, %v1414_v59 }
 0x5e2   : > { %v1424_v18 = vpop.permute.xlu1 %1423  ;;  %v1389_v6 = vadd.f32 %v1387_v46, %v1381_v15  ;;  %v1390_v4 = vadd.f32 %v1388_v27, %v1382_v23  ;;  %v1442_v45 = vpop.permute.xlu0 %1441 }
 0x5e3   : > { %v1427_v5 = vsel %vm793_vm2, %v1424_v18, %v1426_v14  ;;  %v1428_v61 = vsel %vm793_vm2, %v1426_v14, %v1424_v18  ;;  %v1547_v18 = vpop.f32.mrf.mxu1  ;;  %v1562_v9 = vpop.permute.xlu2 %1561 }
 0x5e4   : > { %v1429_v7 = vmul.f32 %v1427_v5, %v799_v42  ;;  %v1430_v8 = vmul.f32 %v1428_v61, %v800_v43  ;;  %v1405_v39 = vadd.f32 %v1403_v62, %v1389_v6  ;;  %v1406_v22 = vadd.f32 %v1404_v2, %v1390_v4  ;;  %v1531_v62 = vpop.f32.mrf.mxu0 }
 0x5e6   : > { %v1421_v53 = vadd.f32 %v1419_v10, %v1405_v39  ;;  %v1422_v50 = vadd.f32 %v1420_v44, %v1406_v22  ;;  %v1435_v42 = vmul.f32 %v1433_v26, %v1429_v7  ;;  %v1436_v28 = vmul.f32 %v1433_v26, %v1430_v8 }
 0x5e8   : > { %v1437_v31 = vadd.f32 %v1435_v42, %v1421_v53  ;;  %v1438_v41 = vadd.f32 %v1436_v28, %v1422_v50 }
 0x5ea   : > { %v1440_v60 = vpop.permute.xlu1 %1439  ;;  %v1474_v14 = vpop.permute.xlu0 %1473 }
 0x5eb   : > { %v1443_v52 = vsel %vm809_vm1, %v1440_v60, %v1442_v45  ;;  %v1444_v40 = vsel %vm809_vm1, %v1442_v45, %v1440_v60  ;;  %v1476_v46 = vperm.slane %v1474_v14, 0  ;;  %v1550_v2 = vpop.f32.mrf.mxu1  ;;  %v1572_v47 = vpop.permute.xlu2 %1571 }
 0x5ec   : > { %v1445_v36 = vmul.f32 %v1443_v52, %v815_v37  ;;  %v1446_v43 = vmul.f32 %v1444_v40, %v816_v38  ;;  %v1533_v26 = vpop.f32.mrf.mxu0  ;;  %v1583_v53 = vmul.f32 %v1572_v47, %v1531_v62  ;;  %v1584_v50 = vmul.f32 %v1572_v47, %v1550_v2 }
 0x5f2   : > { %v1449_v48 = vpop.permute.xlu1 %1448  ;;  %v1594_v60 = vpop.permute.xlu0 %1593 }
 0x5f3   : > { %v1451_v49 = vmul.f32 %v1449_v48, %v1445_v36  ;;  %v1452_v24 = vmul.f32 %v1449_v48, %v1446_v43  ;;  %v1552_v10 = vpop.f32.mrf.mxu1  ;;  %v1599_v42 = vpop.permute.xlu2 %1598  ;;  %v1579_v36 = vmul.f32 %v1562_v9, %v1526_v51  ;;  %v1580_v43 = vmul.f32 %v1562_v9, %v1545_v17 }
 0x5f5   : > { %v1453_v35 = vadd.f32 %v1451_v49, %v1437_v31  ;;  %v1454_v25 = vadd.f32 %v1452_v24, %v1438_v41 }
 0x5f7   : > { %v1456_v32 = vsel %vm1455_vm0, %v1453_v35, 0.0  ;;  %v1463_v33 = vsel %vm1455_vm0, %v1454_v25, 0.0 }
 0x5f8   : > { %v1457_v55 = vrot.slane %v1456_v32, 4  ;;  %v1464_v30 = vrot.slane %v1463_v33, 4 }
 0x5fa   : > { %v1458_v56 = vadd.f32 %v1457_v55, %v1456_v32  ;;  %v1465_v57 = vadd.f32 %v1464_v30, %v1463_v33  ;;  %v1609_v48 = vpop.permute.xlu0 %1608 }
 0x5fb   : > { %v1567_v1 = vpop.permute.xlu1 %1566 }
 0x5fc   : > { %v1459_v37 = vrot.slane %v1458_v56, 2  ;;  %v1466_v58 = vrot.slane %v1465_v57, 2  ;;  %v1581_v44 = vmul.f32 %v1567_v1, %v1528_v11  ;;  %v1582_v45 = vmul.f32 %v1567_v1, %v1547_v18 }
 0x5fe   : > { %v1460_v34 = vadd.f32 %v1459_v37, %v1458_v56  ;;  %v1467_v38 = vadd.f32 %v1466_v58, %v1465_v57  ;;  %v1613_v31 = vadd.f32 %v1599_v42, %v1581_v44  ;;  %v1614_v41 = vadd.f32 %v1599_v42, %v1582_v45 }
 0x600   : > { %v1461_v15 = vrot.slane %v1460_v34, 1  ;;  %v1468_v23 = vrot.slane %v1467_v38, 1 }
 0x602   : > { %v1462_v27 = vadd.f32 %v1461_v15, %v1460_v34  ;;  %v1469_v29 = vadd.f32 %v1468_v23, %v1467_v38  ;;  %v1611_v34 = vadd.f32 %v1594_v60, %v1579_v36 }
 0x603   : > { %v1577_v59 = vpop.permute.xlu1 %1576 }
 0x604   : > { %v1477_v3 = vadd.f32 %v1476_v46, %v1462_v27  ;;  %v1478_v54 = vadd.f32 %v1476_v46, %v1469_v29  ;;  %v1585_v52 = vmul.f32 %v1577_v59, %v1533_v26  ;;  %v1586_v40 = vmul.f32 %v1577_v59, %v1552_v10 }
 0x606   : > { %v1479_v6 = vsub.f32 0.0, %v1477_v3  ;;  %v1480_v4 = vsub.f32 0.0, %v1478_v54  ;;  %v1617_v24 = vadd.f32 %v1609_v48, %v1585_v52  ;;  %v1618_v35 = vadd.f32 %v1609_v48, %v1586_v40 }
 0x608   : > { %v1481_v5 = vmul.f32 1.442695, %v1479_v6  ;;  %v1483_v61 = vmul.f32 1.442695, %v1480_v4 }
 0x60a   : > { %1885 = vpow2.f32 %v1481_v5 }
 0x60b   : > { %1887 = vpow2.f32 %v1483_v61  ;;  %v1604_v28 = vpop.permute.xlu1 %1603 }
 0x60c   : > { %v1615_v25 = vadd.f32 %v1604_v28, %v1583_v53  ;;  %v1616_v32 = vadd.f32 %v1604_v28, %v1584_v50 }
 0x610   : > { %v1886_v7 = vpop.eup %1885 }
 0x611   : > { %v1888_v8 = vpop.eup %1887  ;;  %v1485_v39 = vadd.f32 1.0, %v1886_v7 }
 0x612   : > { %v1486_v22 = vadd.f32 1.0, %v1888_v8 }
 0x613   : > { %1889 = vrcp.f32 %v1485_v39 }
 0x614   : > { %1891 = vrcp.f32 %v1486_v22 }
 0x619   : > { %v1890_v49 = vpop.eup %1889 }
 0x61a   : > { %v1892_v33 = vpop.eup %1891  ;;  %v1489_v55 = vmul.f32 %v1890_v49, %v2481_v12  ;;  %v1495_v30 = vmul.f32 %v1890_v49, %v2503_v63  ;;  %v1491_v56 = vmul.f32 %v1890_v49, %v2487_v19  ;;  %v1493_v51 = vmul.f32 %v1890_v49, %v2497_v16 }
 0x61b   : > { %v1490_v17 = vmul.f32 %v1892_v33, %v2484_v13  ;;  %v1496_v57 = vmul.f32 %v1892_v33, %v2506_v0  ;;  %v1492_v37 = vmul.f32 %v1892_v33, %v2490_v20  ;;  %v1494_v58 = vmul.f32 %v1892_v33, %v2500_v21 }
 0x61c   : > { %v1625_v38 = vadd.f32 %v1617_v24, %v1495_v30  ;;  %v1621_v11 = vadd.f32 %v1613_v31, %v1491_v56  ;;  %v1623_v12 = vadd.f32 %v1615_v25, %v1493_v51  ;;  %v1612_v63 = vadd.f32 %v1594_v60, %v1580_v43 }
 0x61d   : > { %v1626_v18 = vadd.f32 %v1618_v35, %v1496_v57  ;;  %v1622_v14 = vadd.f32 %v1614_v41, %v1492_v37  ;;  %v1624_v15 = vadd.f32 %v1616_v32, %v1494_v58  ;;  %v1619_v16 = vadd.f32 %v1611_v34, %v1489_v55 }
 0x61e   : > { %v1633_v19 = vmax.f32 %v1625_v38, 0.0  ;;  %v1629_v23 = vmax.f32 %v1621_v11, 0.0  ;;  %v1620_v46 = vadd.f32 %v1612_v63, %v1490_v17  ;;  %v1631_v20 = vmax.f32 %v1623_v12, 0.0 }
 0x61f   : > { %v1634_v9 = vmax.f32 %v1626_v18, 0.0  ;;  %v1630_v13 = vmax.f32 %v1622_v14, 0.0  ;;  %v1632_v21 = vmax.f32 %v1624_v15, 0.0  ;;  %v1627_v0 = vmax.f32 %v1619_v16, 0.0 }
 0x620   : > { %1641 = vst [vmem:[%s624_s30 + $0x30] sm:$0xff] %v1633_v19  ;;  %v1628_v27 = vmax.f32 %v1620_v46, 0.0 }
 0x621   : > { %1642 = vst [vmem:[%s624_s30 + $0x38] sm:$0xff] %v1634_v9 }
 0x622   : > { %1637 = vst [vmem:[%s624_s30 + $0x10] sm:$0xff] %v1629_v23 }
 0x623   : > { %1638 = vst [vmem:[%s624_s30 + $0x18] sm:$0xff] %v1630_v13 }
 0x624   : > { %1639 = vst [vmem:[%s624_s30 + $0x20] sm:$0xff] %v1631_v20 }
 0x625   : > { %1640 = vst [vmem:[%s624_s30 + $0x28] sm:$0xff] %v1632_v21 }
 0x626   : > { %1635 = vst [vmem:[%s624_s30] sm:$0xff] %v1627_v0 }
 0x627   : > { %1636 = vst [vmem:[%s624_s30 + $0x8] sm:$0xff] %v1628_v27 }
 0x628   : > { %1920 = shalt.err (!%p1917_p3)
}
 0x629   : > { %s1976_s21 = smov 256  }
 0x62a   : > { %1792 = dma.vmem_to_hbm [thread:$0]  (%p2123_p5), %s1657_s19, 1024, %s1659_s22, %s1644_s0, %s1976_s21, %s1976_s21, %s2773_s28  }
 0x62b PF: > { %p1798_p4 = scmp.ge.s32.totalorder %s1955_s25, 2  ;;  %s1673_s1 = sand.u32 1, %s1943_s23  }
 0x62c   : > { %s1674_s5 = scalar_lea.sflag [#allocation4], %s1673_s1 }
 0x62d   : > { %p1795_p7 = pnand %p1798_p4, %p2127_p6 }
 0x62f   : > { %p1796_p8 = pneg %p1795_p7 }
 0x631   : > { %1938 = dma.done.wait (%p1796_p8), %s1674_s5, 1024  }
 0x632   : > { %1940 = vsyncadd (%p1796_p8), %s1674_s5, 4294966272  ;;  %s2779_s25 = sld [smem:[#allocation7_spill]]  ;;  %s2782_s23 = smov %s1947_s24 }
 0x633   : > { %s2780_s3 = sld [smem:[#allocation6_spill]] }
 0x634   : > { %s2781_s2 = sld [smem:[#allocation8_spill]] }
 0x638   : > { %p32_p9 = scmp.ge.s32.totalorder %s2779_s25, 4  }
 0x639   : > { %s2783_s24 = smov %s2780_s3 }
 0x63a   :  { %34 = sbr.rel (!%p32_p9) target bundleno = 10 (0xa), region = 142 }
 0x63f   :  { %1680 = vsyncpa [#allocation4], 1 }
 0x640   :  { %1682 = vsyncpa [#allocation4 + $0x1], 1 }

</bundles_post_ra>
